<compile_context>
chip_gen: v7x
topology: tpu7x:2x2x1
jax: 0.10.0
libtpu: 0.0.40
codegen_flags: <defaults>
</compile_context>

<pallas_src>
import jax
import jax.numpy as jnp
from jax.experimental import pallas as pl
from jax.experimental.pallas import tpu as pltpu

# ---------------------------------------------------------------------------
# Model dimensions (small, synthetic; mirrors the PyTorch module defaults)
# ---------------------------------------------------------------------------
B = 2                                   # batch
N_POINTS = 64                           # points per cloud (PCAutoEncoder.input_size)
PT_DIM = 3                              # xyz
BNECK = 128                             # bottleneck size
ENC_CH = (64, 128, 128, 256, BNECK)     # PointNet encoder 1x1-conv channels
DEC_CH = (256, 256, N_POINTS * PT_DIM)  # decoder MLP channels

# ---------------------------------------------------------------------------
# Packed-parameter layout: one bf16 weight slab + one f32 bias slab
# ---------------------------------------------------------------------------
K_PAD = 128                             # padded fan-in for the first conv (3 -> 128)
SLAB_LANES = 256                        # lane width of the packed weight slab
OUT_LANES = 256                         # lane width of the single packed output
SIM_LANE = N_POINTS * PT_DIM            # output lane that carries cosine similarity

_FAN_IN = (PT_DIM,) + ENC_CH[:-1] + (BNECK,) + DEC_CH[:-1]   # (3,64,128,128,256,128,256,256)
_FAN_OUT = ENC_CH + DEC_CH                                    # (64,128,128,256,128,256,256,192)
_N_LAYERS = len(_FAN_OUT)                                     # 8
_ROWS = (K_PAD,) + _FAN_IN[1:]                                # fan-in rows as stored in the slab
_OFFSETS = tuple(int(sum(_ROWS[:i])) for i in range(_N_LAYERS))
_TOTAL_ROWS = int(sum(_ROWS))                                 # 1344 (multiple of 16 -> clean bf16 tiling)


# ---------------------------------------------------------------------------
# Fused Pallas kernel: encode(this) + encode(prev) + cosine-sim + decode(prev)
# ---------------------------------------------------------------------------
def fused_forward_kernel(pts_ref, wslab_ref, bias_ref, out_ref):
    """Whole Model.forward in one kernel invocation.

    pts_ref  : (2*B*N, K_PAD) bf16  rows [0,B*N)=this_PC points, [B*N,2*B*N)=prev_PC,
                                    lanes 0..2 = xyz, lanes 3.. = zero padding.
    wslab_ref: (_TOTAL_ROWS, 256) bf16  packed weights (static row offsets).
    bias_ref : (8, 256) f32             packed biases (row j = layer j).
    out_ref  : (B, 256) f32             lanes 0..191 = Y_AE flat, lane 192 = Sim.
    """
    f32 = jnp.float32
    bf16 = jnp.bfloat16

    def dense(h, layer_idx):
        off = _OFFSETS[layer_idx]
        kin = _ROWS[layer_idx]
        # Last decoder layer uses the full 256 lanes (zero-padded beyond 192)
        # so the result is already a lane-dense (B, 256) slab.
        kout = OUT_LANES if layer_idx == _N_LAYERS - 1 else _FAN_OUT[layer_idx]
        w = wslab_ref[off:off + kin, :kout]                      # bf16 (kin, kout)
        b = bias_ref[layer_idx:layer_idx + 1, :kout]             # f32  (1, kout)
        return jnp.dot(h.astype(bf16), w, preferred_element_type=f32) + b

    # ---- PointNet encoder: 1x1 Conv1d == per-point matmul on the row slab ----
    x = pts_ref[...]                                             # (2*B*N, 128) bf16
    h = jnp.maximum(dense(x, 0), 0.0)                            # (256, 64)
    h = jnp.maximum(dense(h, 1), 0.0)                            # (256, 128)
    h = jnp.maximum(dense(h, 2), 0.0)                            # (256, 128)
    h = jnp.maximum(dense(h, 3), 0.0)                            # (256, 256)
    # TODO(synk): assumes no ReLU after the last encoder conv (before max-pool);
    # verify against the actual PCAutoEncoder implementation.
    h = dense(h, 4)                                              # (256, BNECK)

    # ---- max-pool over points: one sublane reduction per (cloud, batch) seg ----
    codes = jnp.max(h.reshape(2 * B, N_POINTS, BNECK), axis=1)   # (2B, BNECK)
    X = codes[:B]                                                # encode(this_PC)
    Y = codes[B:]                                                # encode(prev_PC)

    # ---- cosine similarity (F.cosine_similarity, dim=1, eps=1e-8) ----
    eps = jnp.float32(1e-8)
    xn = jnp.sqrt(jnp.sum(X * X, axis=1, keepdims=True))
    yn = jnp.sqrt(jnp.sum(Y * Y, axis=1, keepdims=True))
    num = jnp.sum(X * Y, axis=1, keepdims=True)
    sim = num / (jnp.maximum(xn, eps) * jnp.maximum(yn, eps))    # (B, 1)

    # ---- decoder MLP on prev code: 128 -> 256 -> 256 -> N*3 (no final act) ----
    d = jnp.maximum(dense(Y, 5), 0.0)                            # (B, 256)
    d = jnp.maximum(dense(d, 6), 0.0)                            # (B, 256)
    yae = dense(d, 7)                                            # (B, 256); lanes >=192 are 0

    # ---- single lane-dense output slab: Y_AE in lanes [0,192), Sim at lane 192 ----
    lane = jax.lax.broadcasted_iota(jnp.int32, (B, OUT_LANES), 1)
    out_ref[...] = jnp.where(lane == SIM_LANE, sim, yae)


# ---------------------------------------------------------------------------
# Wrapper
# ---------------------------------------------------------------------------
def model_forward(this_pc_c3n, prev_pc_c3n, wslab, bslab):
    """Mirrors Model.forward.

    this_pc_c3n / prev_pc_c3n: (B, 3, N) float32 (PyTorch Conv1d layout).
    wslab: (_TOTAL_ROWS, 256) bf16 packed weights; bslab: (8, 256) f32 packed biases.
    Returns (Sim: (B,), Y_AE: (B, N, 3)).
    """
    b, c, n = this_pc_c3n.shape

    # Single fused XLA prep op: stack both clouds, go to per-point rows,
    # zero-pad to a lane-dense 128-wide bf16 slab.
    pts = jnp.concatenate([this_pc_c3n, prev_pc_c3n], axis=0)            # (2B, 3, N)
    pts = jnp.transpose(pts, (0, 2, 1)).reshape(2 * b * n, c)            # (2B*N, 3)
    pts = jnp.pad(pts, ((0, 0), (0, K_PAD - c))).astype(jnp.bfloat16)    # (2B*N, 128)

    out = pl.pallas_call(
        fused_forward_kernel,
        out_shape=jax.ShapeDtypeStruct((b, OUT_LANES), jnp.float32),
        in_specs=[pl.BlockSpec(memory_space=pltpu.MemorySpace.VMEM)] * 3,
        out_specs=pl.BlockSpec(memory_space=pltpu.MemorySpace.VMEM),
        cost_estimate=pl.CostEstimate(flops=51_000_000,
                                      transcendentals=0,
                                      bytes_accessed=750_000),
    )(pts, wslab, bslab)

    sim = out[:, SIM_LANE]                                               # (B,)
    y_ae = out[:, :n * c].reshape(b, n, c)                               # (B, N, 3)
    return sim, y_ae


# ---------------------------------------------------------------------------
# Deterministic parameter init (PyTorch-style uniform(+-1/sqrt(fan_in)))
# ---------------------------------------------------------------------------
def init_params(key):
    def linear(key, fan_in, fan_out):
        kw, kb = jax.random.split(key)
        bound = 1.0 / jnp.sqrt(jnp.float32(fan_in))
        w = jax.random.uniform(kw, (fan_in, fan_out), jnp.float32, -bound, bound)
        b = jax.random.uniform(kb, (1, fan_out), jnp.float32, -bound, bound)
        return w, b

    keys = jax.random.split(key, 16)
    enc, k_idx = [], 0
    cin = PT_DIM
    for cout in ENC_CH:
        enc.append(linear(keys[k_idx], cin, cout)); k_idx += 1
        cin = cout
    dec = []
    cin = BNECK
    for cout in DEC_CH:
        dec.append(linear(keys[k_idx], cin, cout)); k_idx += 1
        cin = cout
    # TODO(synk): self.score = Linear(bneck*2, 1) exists in the module but is
    # unused in forward(); kept here only so the parameter set matches.
    score = linear(keys[k_idx], BNECK * 2, 1)
    return {"enc": enc, "dec": dec, "score": score}


def pack_params(params):
    """Pack all 8 (w, b) layers into one bf16 weight slab + one f32 bias slab."""
    layers = list(params["enc"]) + list(params["dec"])
    assert len(layers) == _N_LAYERS
    wslab = jnp.zeros((_TOTAL_ROWS, SLAB_LANES), jnp.float32)
    bslab = jnp.zeros((_N_LAYERS, SLAB_LANES), jnp.float32)
    for i, (w, bias) in enumerate(layers):
        fi, fo = w.shape
        r0 = _OFFSETS[i]
        wslab = wslab.at[r0:r0 + fi, :fo].set(w)     # fan-in rows beyond fi stay zero
        bslab = bslab.at[i, :fo].set(bias.reshape(-1))
    return wslab.astype(jnp.bfloat16), bslab


# ---------------------------------------------------------------------------
# Pure-JAX reference (on-device sanity check, uses the original f32 params)
# ---------------------------------------------------------------------------
def reference_forward(this_pc, prev_pc, params):
    def enc_fn(pc):
        h = jnp.transpose(pc, (0, 2, 1))                          # (B, N, 3)
        n_layers = len(params["enc"])
        for i, (w, bias) in enumerate(params["enc"]):
            h = jnp.einsum("bnc,co->bno", h, w) + bias
            if i < n_layers - 1:
                h = jnp.maximum(h, 0.0)
        return jnp.max(h, axis=1)                                 # (B, BNECK)

    X = enc_fn(this_pc)
    Y = enc_fn(prev_pc)
    d = Y
    n_layers = len(params["dec"])
    for i, (w, bias) in enumerate(params["dec"]):
        d = d @ w + bias
        if i < n_layers - 1:
            d = jnp.maximum(d, 0.0)
    eps = 1e-8
    xn = jnp.maximum(jnp.sqrt(jnp.sum(X * X, axis=1)), eps)
    yn = jnp.maximum(jnp.sqrt(jnp.sum(Y * Y, axis=1)), eps)
    sim = jnp.sum(X * Y, axis=1) / (xn * yn)
    return sim, d.reshape(d.shape[0], N_POINTS, PT_DIM)


# ---------------------------------------------------------------------------
if __name__ == "__main__":
    key = jax.random.PRNGKey(0)
    kp, kx, ky = jax.random.split(key, 3)
    params = init_params(kp)
    wslab, bslab = pack_params(params)

    # Point clouds in PyTorch layout (B, 3, N)
    this_pc = jax.random.normal(kx, (B, PT_DIM, N_POINTS), jnp.float32)
    prev_pc = jax.random.normal(ky, (B, PT_DIM, N_POINTS), jnp.float32)

    fwd = jax.jit(model_forward)
    sim, y_ae = fwd(this_pc, prev_pc, wslab, bslab)
    jax.block_until_ready((sim, y_ae))

    ref_sim, ref_yae = reference_forward(this_pc, prev_pc, params)

    assert sim.shape == (B,) and sim.dtype == jnp.float32
    assert y_ae.shape == (B, N_POINTS, PT_DIM) and y_ae.dtype == jnp.float32
    assert bool(jnp.all(jnp.isfinite(sim))) and bool(jnp.all(jnp.isfinite(y_ae)))
    # bf16 weights -> slightly looser tolerance for the reconstruction.
    assert bool(jnp.allclose(sim, ref_sim, atol=2e-2, rtol=2e-2))
    assert bool(jnp.allclose(y_ae, ref_yae, atol=3e-2, rtol=3e-2))
    print("KERNEL_OK")
</pallas_src>

<mosaic_0001>
module attributes {stable_mosaic.version = 11 : i64} {
  func.func @fused_forward_kernel(%arg0: memref<256x128xbf16, #tpu.memory_space<vmem>>, %arg1: memref<1344x256xbf16, #tpu.memory_space<vmem>>, %arg2: memref<8x256xf32, #tpu.memory_space<vmem>>, %arg3: memref<2x256xf32, #tpu.memory_space<vmem>>) attributes {dimension_semantics = [], scalar_prefetch = 0 : i64, scratch_operands = 0 : i64, tpu.core_type = #tpu.core_type<tc>} {
    %c0 = arith.constant 0 : index
    %c0_0 = arith.constant 0 : index
    %0 = vector.load %arg0[%c0, %c0_0] : memref<256x128xbf16, #tpu.memory_space<vmem>>, vector<256x128xbf16>
    %c0_1 = arith.constant 0 : index
    %c0_2 = arith.constant 0 : index
    %1 = vector.load %arg1[%c0_1, %c0_2] : memref<1344x256xbf16, #tpu.memory_space<vmem>>, vector<128x64xbf16>
    %c0_3 = arith.constant 0 : index
    %c0_4 = arith.constant 0 : index
    %2 = vector.load %arg2[%c0_3, %c0_4] : memref<8x256xf32, #tpu.memory_space<vmem>>, vector<1x64xf32>
    %cst = arith.constant dense<0.000000e+00> : vector<256x64xf32>
    %3 = tpu.matmul %0, %1, %cst {dimension_numbers = #tpu.dot_dimension_numbers<[1], [0], [0], [1], [0, 0, 1, 1], [], []>} : vector<256x128xbf16>, vector<128x64xbf16>, vector<256x64xf32> -> vector<256x64xf32>
    %4 = vector.broadcast %2 : vector<1x64xf32> to vector<256x64xf32>
    %5 = arith.addf %3, %4 : vector<256x64xf32>
    %cst_5 = arith.constant 0.000000e+00 : f32
    %6 = vector.broadcast %cst_5 : f32 to vector<256x64xf32>
    %7 = arith.maximumf %5, %6 : vector<256x64xf32>
    %c128 = arith.constant 128 : index
    %c0_6 = arith.constant 0 : index
    %8 = vector.load %arg1[%c128, %c0_6] : memref<1344x256xbf16, #tpu.memory_space<vmem>>, vector<64x128xbf16>
    %c1 = arith.constant 1 : index
    %c0_7 = arith.constant 0 : index
    %9 = vector.load %arg2[%c1, %c0_7] : memref<8x256xf32, #tpu.memory_space<vmem>>, vector<1x128xf32>
    %10 = arith.truncf %7 : vector<256x64xf32> to vector<256x64xbf16>
    %cst_8 = arith.constant dense<0.000000e+00> : vector<256x128xf32>
    %11 = tpu.matmul %10, %8, %cst_8 {dimension_numbers = #tpu.dot_dimension_numbers<[1], [0], [0], [1], [0, 0, 1, 1], [], []>} : vector<256x64xbf16>, vector<64x128xbf16>, vector<256x128xf32> -> vector<256x128xf32>
    %12 = vector.broadcast %9 : vector<1x128xf32> to vector<256x128xf32>
    %13 = arith.addf %11, %12 : vector<256x128xf32>
    %cst_9 = arith.constant 0.000000e+00 : f32
    %14 = vector.broadcast %cst_9 : f32 to vector<256x128xf32>
    %15 = arith.maximumf %13, %14 : vector<256x128xf32>
    %c192 = arith.constant 192 : index
    %c0_10 = arith.constant 0 : index
    %16 = vector.load %arg1[%c192, %c0_10] : memref<1344x256xbf16, #tpu.memory_space<vmem>>, vector<128x128xbf16>
    %c2 = arith.constant 2 : index
    %c0_11 = arith.constant 0 : index
    %17 = vector.load %arg2[%c2, %c0_11] : memref<8x256xf32, #tpu.memory_space<vmem>>, vector<1x128xf32>
    %18 = arith.truncf %15 : vector<256x128xf32> to vector<256x128xbf16>
    %cst_12 = arith.constant dense<0.000000e+00> : vector<256x128xf32>
    %19 = tpu.matmul %18, %16, %cst_12 {dimension_numbers = #tpu.dot_dimension_numbers<[1], [0], [0], [1], [0, 0, 1, 1], [], []>} : vector<256x128xbf16>, vector<128x128xbf16>, vector<256x128xf32> -> vector<256x128xf32>
    %20 = vector.broadcast %17 : vector<1x128xf32> to vector<256x128xf32>
    %21 = arith.addf %19, %20 : vector<256x128xf32>
    %cst_13 = arith.constant 0.000000e+00 : f32
    %22 = vector.broadcast %cst_13 : f32 to vector<256x128xf32>
    %23 = arith.maximumf %21, %22 : vector<256x128xf32>
    %c320 = arith.constant 320 : index
    %c0_14 = arith.constant 0 : index
    %24 = vector.load %arg1[%c320, %c0_14] : memref<1344x256xbf16, #tpu.memory_space<vmem>>, vector<128x256xbf16>
    %c3 = arith.constant 3 : index
    %c0_15 = arith.constant 0 : index
    %25 = vector.load %arg2[%c3, %c0_15] : memref<8x256xf32, #tpu.memory_space<vmem>>, vector<1x256xf32>
    %26 = arith.truncf %23 : vector<256x128xf32> to vector<256x128xbf16>
    %cst_16 = arith.constant dense<0.000000e+00> : vector<256x256xf32>
    %27 = tpu.matmul %26, %24, %cst_16 {dimension_numbers = #tpu.dot_dimension_numbers<[1], [0], [0], [1], [0, 0, 1, 1], [], []>} : vector<256x128xbf16>, vector<128x256xbf16>, vector<256x256xf32> -> vector<256x256xf32>
    %28 = vector.broadcast %25 : vector<1x256xf32> to vector<256x256xf32>
    %29 = arith.addf %27, %28 : vector<256x256xf32>
    %cst_17 = arith.constant 0.000000e+00 : f32
    %30 = vector.broadcast %cst_17 : f32 to vector<256x256xf32>
    %31 = arith.maximumf %29, %30 : vector<256x256xf32>
    %c448 = arith.constant 448 : index
    %c0_18 = arith.constant 0 : index
    %32 = vector.load %arg1[%c448, %c0_18] : memref<1344x256xbf16, #tpu.memory_space<vmem>>, vector<256x128xbf16>
    %c4 = arith.constant 4 : index
    %c0_19 = arith.constant 0 : index
    %33 = vector.load %arg2[%c4, %c0_19] : memref<8x256xf32, #tpu.memory_space<vmem>>, vector<1x128xf32>
    %34 = arith.truncf %31 : vector<256x256xf32> to vector<256x256xbf16>
    %cst_20 = arith.constant dense<0.000000e+00> : vector<256x128xf32>
    %35 = tpu.matmul %34, %32, %cst_20 {dimension_numbers = #tpu.dot_dimension_numbers<[1], [0], [0], [1], [0, 0, 1, 1], [], []>} : vector<256x256xbf16>, vector<256x128xbf16>, vector<256x128xf32> -> vector<256x128xf32>
    %36 = vector.broadcast %33 : vector<1x128xf32> to vector<256x128xf32>
    %37 = arith.addf %35, %36 : vector<256x128xf32>
    %38 = vector.shape_cast %37 : vector<256x128xf32> to vector<4x64x128xf32>
    %cst_21 = arith.constant dense<0xFF800000> : vector<4x128xf32>
    %39 = vector.multi_reduction <maximumf>, %38, %cst_21 [1] : vector<4x64x128xf32> to vector<4x128xf32>
    %40 = vector.extract_strided_slice %39 {offsets = [0, 0], sizes = [2, 128], strides = [1, 1]} : vector<4x128xf32> to vector<2x128xf32>
    %41 = vector.extract_strided_slice %39 {offsets = [2, 0], sizes = [2, 128], strides = [1, 1]} : vector<4x128xf32> to vector<2x128xf32>
    %42 = arith.mulf %40, %40 : vector<2x128xf32>
    %cst_22 = arith.constant dense<0.000000e+00> : vector<2xf32>
    %43 = vector.multi_reduction <add>, %42, %cst_22 [1] : vector<2x128xf32> to vector<2xf32>
    %44 = vector.shape_cast %43 : vector<2xf32> to vector<2x1xf32>
    %45 = math.sqrt %44 : vector<2x1xf32>
    %46 = arith.mulf %41, %41 : vector<2x128xf32>
    %cst_23 = arith.constant dense<0.000000e+00> : vector<2xf32>
    %47 = vector.multi_reduction <add>, %46, %cst_23 [1] : vector<2x128xf32> to vector<2xf32>
    %48 = vector.shape_cast %47 : vector<2xf32> to vector<2x1xf32>
    %49 = math.sqrt %48 : vector<2x1xf32>
    %50 = arith.mulf %40, %41 : vector<2x128xf32>
    %cst_24 = arith.constant dense<0.000000e+00> : vector<2xf32>
    %51 = vector.multi_reduction <add>, %50, %cst_24 [1] : vector<2x128xf32> to vector<2xf32>
    %52 = vector.shape_cast %51 : vector<2xf32> to vector<2x1xf32>
    %cst_25 = arith.constant 9.99999993E-9 : f32
    %53 = vector.broadcast %cst_25 : f32 to vector<2x1xf32>
    %54 = arith.maximumf %45, %53 : vector<2x1xf32>
    %cst_26 = arith.constant 9.99999993E-9 : f32
    %55 = vector.broadcast %cst_26 : f32 to vector<2x1xf32>
    %56 = arith.maximumf %49, %55 : vector<2x1xf32>
    %57 = arith.mulf %54, %56 : vector<2x1xf32>
    %58 = arith.divf %52, %57 : vector<2x1xf32>
    %c704 = arith.constant 704 : index
    %c0_27 = arith.constant 0 : index
    %59 = vector.load %arg1[%c704, %c0_27] : memref<1344x256xbf16, #tpu.memory_space<vmem>>, vector<128x256xbf16>
    %c5 = arith.constant 5 : index
    %c0_28 = arith.constant 0 : index
    %60 = vector.load %arg2[%c5, %c0_28] : memref<8x256xf32, #tpu.memory_space<vmem>>, vector<1x256xf32>
    %61 = arith.truncf %41 : vector<2x128xf32> to vector<2x128xbf16>
    %cst_29 = arith.constant dense<0.000000e+00> : vector<2x256xf32>
    %62 = tpu.matmul %61, %59, %cst_29 {dimension_numbers = #tpu.dot_dimension_numbers<[1], [0], [0], [1], [0, 0, 1, 1], [], []>} : vector<2x128xbf16>, vector<128x256xbf16>, vector<2x256xf32> -> vector<2x256xf32>
    %63 = vector.broadcast %60 : vector<1x256xf32> to vector<2x256xf32>
    %64 = arith.addf %62, %63 : vector<2x256xf32>
    %cst_30 = arith.constant 0.000000e+00 : f32
    %65 = vector.broadcast %cst_30 : f32 to vector<2x256xf32>
    %66 = arith.maximumf %64, %65 : vector<2x256xf32>
    %c832 = arith.constant 832 : index
    %c0_31 = arith.constant 0 : index
    %67 = vector.load %arg1[%c832, %c0_31] : memref<1344x256xbf16, #tpu.memory_space<vmem>>, vector<256x256xbf16>
    %c6 = arith.constant 6 : index
    %c0_32 = arith.constant 0 : index
    %68 = vector.load %arg2[%c6, %c0_32] : memref<8x256xf32, #tpu.memory_space<vmem>>, vector<1x256xf32>
    %69 = arith.truncf %66 : vector<2x256xf32> to vector<2x256xbf16>
    %cst_33 = arith.constant dense<0.000000e+00> : vector<2x256xf32>
    %70 = tpu.matmul %69, %67, %cst_33 {dimension_numbers = #tpu.dot_dimension_numbers<[1], [0], [0], [1], [0, 0, 1, 1], [], []>} : vector<2x256xbf16>, vector<256x256xbf16>, vector<2x256xf32> -> vector<2x256xf32>
    %71 = vector.broadcast %68 : vector<1x256xf32> to vector<2x256xf32>
    %72 = arith.addf %70, %71 : vector<2x256xf32>
    %cst_34 = arith.constant 0.000000e+00 : f32
    %73 = vector.broadcast %cst_34 : f32 to vector<2x256xf32>
    %74 = arith.maximumf %72, %73 : vector<2x256xf32>
    %c1088 = arith.constant 1088 : index
    %c0_35 = arith.constant 0 : index
    %75 = vector.load %arg1[%c1088, %c0_35] : memref<1344x256xbf16, #tpu.memory_space<vmem>>, vector<256x256xbf16>
    %c7 = arith.constant 7 : index
    %c0_36 = arith.constant 0 : index
    %76 = vector.load %arg2[%c7, %c0_36] : memref<8x256xf32, #tpu.memory_space<vmem>>, vector<1x256xf32>
    %77 = arith.truncf %74 : vector<2x256xf32> to vector<2x256xbf16>
    %cst_37 = arith.constant dense<0.000000e+00> : vector<2x256xf32>
    %78 = tpu.matmul %77, %75, %cst_37 {dimension_numbers = #tpu.dot_dimension_numbers<[1], [0], [0], [1], [0, 0, 1, 1], [], []>} : vector<2x256xbf16>, vector<256x256xbf16>, vector<2x256xf32> -> vector<2x256xf32>
    %79 = vector.broadcast %76 : vector<1x256xf32> to vector<2x256xf32>
    %80 = arith.addf %78, %79 : vector<2x256xf32>
    %81 = tpu.iota {dimensions = array<i32: 1>} : vector<2x256xi32>
    %c192_i32 = arith.constant 192 : i32
    %82 = vector.broadcast %c192_i32 : i32 to vector<2x256xi32>
    %83 = arith.cmpi eq, %81, %82 : vector<2x256xi32>
    %84 = vector.shape_cast %58 : vector<2x1xf32> to vector<2x1xf32>
    %85 = vector.broadcast %84 : vector<2x1xf32> to vector<2x256xf32>
    %86 = arith.select %83, %85, %80 : vector<2x256xi1>, vector<2x256xf32>
    %c0_38 = arith.constant 0 : index
    %c0_39 = arith.constant 0 : index
    %87 = vector.load %arg3[%c0_38, %c0_39] : memref<2x256xf32, #tpu.memory_space<vmem>>, vector<2x256xf32>
    tpu.vector_store %arg3[%c0_38, %c0_39], %86 {strides = array<i32>} : memref<2x256xf32, #tpu.memory_space<vmem>>, vector<2x256xf32>,
    return
  }
}

</mosaic_0001>

<bundles_post_ra>
// kernel: model_forward.1
= control target key start
LH: loop header
LB: loop body
LE: loop exit
PB: predicated region body
PF: predicated region fallthrough
CT: control target
= control target key end

     0   :  { %8 = vsyncpa [#allocation3], 0  ;;  %s3182_s12 = smov [#allocation2]   ;;  %s3559_s0 = inlined_call_operand.vmem [shape: bf16[256,128], index: 0, kind: input, shape index: {}]   ;;  %s3560_s1 = inlined_call_operand.hbm [shape: bf16[1344,256], index: 1, kind: input, shape index: {}]   ;;  %s3561_s2 = inlined_call_operand.vmem [shape: f32[8,256], index: 2, kind: input, shape index: {}]   ;;  %s3562_s3 = inlined_call_operand.vmem [shape: f32[2,256], index: 3, kind: output, shape index: {}]  }
   0x1   :  { %s16_s13 = sshll.u32 %s3182_s12, 4  ;;  %s3158_s16 = scalar_lea.hbm %s3560_s1, 21504  ;;  %s17_s13 = int_to_ptr.vmem [resolvable:$true] %s16_s13 }
   0x2   :  { %p3159_p0 = scmp.ne.s32.totalorder %s3560_s1, %s3158_s16  ;;  %p3162_p1 = scmp.lt.u32.totalorder %s3158_s16, %s3560_s1 }
   0x4   :  { %p3164_p2 = pnand %p3162_p1, %p3159_p0 }
   0x6   :  { %3167 = shalt.err (!%p3164_p2)
}
   0x7   :  { %s3168_s21 = scalar_lea.vmem %s17_s13, 21504  ;;  %p3173_p4 = scmp.lt.s32.totalorder %s17_s13, %s17_s13 }
   0x8   :  { %p3169_p3 = scmp.ne.s32.totalorder %s17_s13, %s3168_s21  ;;  %p3174_p5 = scmp.lt.s32.totalorder %s3168_s21, %s3168_s21 }
   0xa   :  { %p3175_p6 = por %p3174_p5, %p3173_p4 }
   0xc   :  { %p3176_p7 = pnand %p3175_p6, %p3169_p3 }
   0xe   :  { %3179 = shalt.err (!%p3176_p7)
}
   0xf   :  { %s3183_s22 = smov 128   ;;  %s3184_s23 = smov 8  }
  0x10   :  { %22 = dma.hbm_to_vmem [thread:$0]  %s3560_s1, 21504, %s17_s13, [#allocation3], %s3183_s22, %s3183_s22, %s3184_s23  }
  0x11   :  { %3180 = dma.done.wait [#allocation3], 21504  }
  0x12   :  { %3181 = vsyncadd [#allocation3], 4294945792  ;;  %v2956_v0 = vld [vmem:[#allocation2] ss:$8 sps:$4 sm:$0xff]   ;;  %v2957_v1 = vld [vmem:[#allocation2 + $0x10] ss:$8 sps:$4 sm:$0xff]  }
  0x13   :  { %2816 = vmatprep.subr.bf16.mxu0 %v2956_v0  ;;  %v2958_v2 = vld [vmem:[#allocation2 + $0x20] ss:$8 sps:$4 sm:$0xff]   ;;  %v2959_v3 = vld [vmem:[#allocation2 + $0x30] ss:$8 sps:$4 sm:$0xff]   ;;  %vm464_vm0 = vcmask 523264   ;;  %vm1740_vm1 = vcmask 1041409  }
  0x14   :  { %2817 = vmatpush3.bf16.msra.mxu0 %v2956_v0  ;;  %v2964_v4 = vld [vmem:[%s3559_s0] sm:$0xff]   ;;  %v2961_v6 = vld [vmem:[#allocation2 + $0x50] ss:$8 sps:$4 sm:$0xff]   ;;  %v2965_v11 = vld [vmem:[%s3559_s0 + $0x8] sm:$0xff]   ;;  %vm1743_vm2 = vcmask 1041408  }
  0x15   :  { %2818 = vmatprep.subr.bf16.mxu0 %v2957_v1  ;;  %2832 = vmatprep.mubr.bf16.mxu0 %v2964_v4  ;;  %v2960_v5 = vld [vmem:[#allocation2 + $0x40] ss:$8 sps:$4 sm:$0xff]   ;;  %v2963_v8 = vld [vmem:[#allocation2 + $0x70] ss:$8 sps:$4 sm:$0xff]  }
  0x16   :  { %v2962_v7 = vld [vmem:[#allocation2 + $0x60] ss:$8 sps:$4 sm:$0xff]   ;;  %v2981_v10 = vld [vmem:[#allocation2 + $0x90] ss:$8 sps:$4 sm:$0xff]  }
  0x17   :  { %v2980_v9 = vld [vmem:[#allocation2 + $0x80] ss:$8 sps:$4 sm:$0xff]   ;;  %v2966_v12 = vld [vmem:[%s3559_s0 + $0x10] sm:$0xff]   ;;  %v2967_v13 = vld [vmem:[%s3559_s0 + $0x18] sm:$0xff]  }
  0x18   :  { %2819 = vmatpush3.bf16.msra.mxu0 %v2957_v1  ;;  %2864 = vmatprep.subr.bf16.mxu1 %v2980_v9  ;;  %v2968_v14 = vld [vmem:[%s3559_s0 + $0x20] sm:$0xff]   ;;  %v2969_v15 = vld [vmem:[%s3559_s0 + $0x28] sm:$0xff]   ;;  %v2970_v16 = vld [vmem:[%s3559_s0 + $0x30] sm:$0xff]  }
  0x19   :  { %2820 = vmatprep.subr.bf16.mxu0 %v2958_v2  ;;  %2865 = vmatpush3.bf16.msra.mxu1 %v2980_v9  ;;  %v2971_v17 = vld [vmem:[%s3559_s0 + $0x38] sm:$0xff]   ;;  %v2972_v18 = vld [vmem:[%s3559_s0 + $0x40] sm:$0xff]   ;;  %v2973_v19 = vld [vmem:[%s3559_s0 + $0x48] sm:$0xff]  }
  0x1a   :  { %2866 = vmatprep.subr.bf16.mxu1 %v2981_v10  ;;  %v2974_v20 = vld [vmem:[%s3559_s0 + $0x50] sm:$0xff]   ;;  %v2975_v21 = vld [vmem:[%s3559_s0 + $0x58] sm:$0xff]   ;;  %v2976_v22 = vld [vmem:[%s3559_s0 + $0x60] sm:$0xff]  }
  0x1b   :  { %v2977_v23 = vld [vmem:[%s3559_s0 + $0x68] sm:$0xff]   ;;  %v2978_v24 = vld [vmem:[%s3559_s0 + $0x70] sm:$0xff]   ;;  %v2979_v25 = vld [vmem:[%s3559_s0 + $0x78] sm:$0xff]  }
  0x1c   :  { %2821 = vmatpush3.bf16.msra.mxu0 %v2958_v2  ;;  %v2982_v26 = vld [vmem:[#allocation2 + $0xa0] ss:$8 sps:$4 sm:$0xff]   ;;  %v2983_v27 = vld [vmem:[#allocation2 + $0xb0] ss:$8 sps:$4 sm:$0xff]  }
  0x1d   :  { %2822 = vmatprep.subr.bf16.mxu0 %v2959_v3  ;;  %2867 = vmatpush3.bf16.msra.mxu1 %v2981_v10  ;;  %v2984_v28 = vld [vmem:[#allocation2 + $0xc0] ss:$8 sps:$4 sm:$0xff]   ;;  %v2985_v47 = vld [vmem:[#allocation2 + $0xd0] ss:$8 sps:$4 sm:$0xff]  }
  0x1e   :  { %2868 = vmatprep.subr.bf16.mxu1 %v2982_v26  ;;  %v3269_v29 = vld [vmem:[%s3561_s2] ss:$0 sm:$0xff]  ;;  %v2987_v63 = vld [vmem:[#allocation2 + $0xf0] ss:$8 sps:$4 sm:$0xff]  }
  0x1f   :  { %v2986_v56 = vld [vmem:[#allocation2 + $0xe0] ss:$8 sps:$4 sm:$0xff]  }
  0x20   :  { %2823 = vmatpush3.bf16.msra.mxu0 %v2959_v3 }
  0x21   :  { %2824 = vmatprep.subr.bf16.mxu0 %v2960_v5  ;;  %2869 = vmatpush3.bf16.msra.mxu1 %v2982_v26 }
  0x22   :  { %2870 = vmatprep.subr.bf16.mxu1 %v2983_v27 }
  0x24   :  { %2825 = vmatpush3.bf16.msra.mxu0 %v2960_v5 }
  0x25   :  { %2826 = vmatprep.subr.bf16.mxu0 %v2961_v6  ;;  %2871 = vmatpush3.bf16.msra.mxu1 %v2983_v27 }
  0x26   :  { %2904 = vmatprep.subr.bf16.mxu1 %v2984_v28 }
  0x28   :  { %2827 = vmatpush3.bf16.msra.mxu0 %v2961_v6 }
  0x29   :  { %2828 = vmatprep.subr.bf16.mxu0 %v2962_v7 }
  0x2c   :  { %2829 = vmatpush3.bf16.msra.mxu0 %v2962_v7 }
  0x2d   :  { %2830 = vmatprep.subr.bf16.mxu0 %v2963_v8 }
  0x30   :  { %2831 = vmatpush3.bf16.msra.mxu0 %v2963_v8  ;;  %v2988_v8 = vld [vmem:[#allocation2 + $0x100] ss:$8 sps:$4 sm:$0xff]  }
  0x33   :  { %2833 = vmatmul.mubr.bf16.vlgmr.msra.gmra.mrb[0].mxu0 %v2965_v11 }
  0x34   :  { %2836 = vmatprep.mubr.bf16.mxu0 %v2966_v12 }
  0x3b   :  { %2837 = vmatmul.mubr.bf16.gmra.mrb[4].mxu0 %v2967_v13 }
  0x3c   :  { %2840 = vmatprep.mubr.bf16.mxu0 %v2968_v14 }
  0x43   :  { %2841 = vmatmul.mubr.bf16.gmra.mrb[8].mxu0 %v2969_v15  ;;  %v2989_v15 = vld [vmem:[#allocation2 + $0x110] ss:$8 sps:$4 sm:$0xff]  }
  0x44   :  { %2844 = vmatprep.mubr.bf16.mxu0 %v2970_v16 }
  0x4b   :  { %2845 = vmatmul.mubr.bf16.gmra.mrb[12].mxu0 %v2971_v17 }
  0x4c   :  { %2848 = vmatprep.mubr.bf16.mxu0 %v2972_v18 }
  0x53   :  { %2849 = vmatmul.mubr.bf16.gmra.mrb[16].mxu0 %v2973_v19 }
  0x54   :  { %2852 = vmatprep.mubr.bf16.mxu0 %v2974_v20 }
  0x5b   :  { %2853 = vmatmul.mubr.bf16.gmra.mrb[20].mxu0 %v2975_v21 }
  0x5c   :  { %2856 = vmatprep.mubr.bf16.mxu0 %v2976_v22 }
  0x63   :  { %2857 = vmatmul.mubr.bf16.gmra.mrb[24].mxu0 %v2977_v23 }
  0x64   :  { %2860 = vmatprep.mubr.bf16.mxu0 %v2978_v24  ;;  %v2990_v24 = vld [vmem:[#allocation2 + $0x120] ss:$8 sps:$4 sm:$0xff]  }
  0x6b   :  { %2861 = vmatmul.mubr.bf16.gmra.mrb[28].mxu0 %v2979_v25 }
 0x106   :  { %v2834_v30 = vpop.f32.mrb[0].mxu0 }
 0x107   :  { %v265_v31 = vadd.f32 %v2834_v30, %v3269_v29  ;;  %v256_v32 = vpop.f32.mrb[1].mxu0 }
 0x108   :  { %v257_v33 = vadd.f32 %v256_v32, %v3269_v29  ;;  %v2835_v34 = vpop.f32.mrb[2].mxu0 }
 0x109   :  { %v268_v35 = vadd.f32 %v2835_v34, %v3269_v29  ;;  %v259_v36 = vpop.f32.mrb[3].mxu0  ;;  %v385_v38 = vmax.f32 %v265_v31, 0.0 }
 0x10a   :  { %v260_v37 = vadd.f32 %v259_v36, %v3269_v29  ;;  %v383_v40 = vmax.f32 %v257_v33, 0.0 }
 0x10b   :  { %v386_v39 = vmax.f32 %v268_v35, 0.0 }
 0x10c   :  { %v384_v41 = vmax.f32 %v260_v37, 0.0 }
 0x10d   :  { %v425_v42 = vpack.c.bf16 %v386_v39, %v385_v38 }
 0x10e   :  { %v2838_v43 = vpop.f32.mrb[4].mxu0  ;;  %v424_v44 = vpack.c.bf16 %v384_v41, %v383_v40 }
 0x10f   :  { %v281_v45 = vadd.f32 %v2838_v43, %v3269_v29  ;;  %v272_v46 = vpop.f32.mrb[5].mxu0 }
 0x110   :  { %v273_v48 = vadd.f32 %v272_v46, %v3269_v29  ;;  %v2839_v49 = vpop.f32.mrb[6].mxu0  ;;  %2872 = vmatprep.mubr.msk.bf16.mxu1 %vm464_vm0, %v424_v44 }
 0x111   :  { %v389_v50 = vmax.f32 %v281_v45, 0.0  ;;  %v284_v51 = vadd.f32 %v2839_v49, %v3269_v29  ;;  %v275_v52 = vpop.f32.mrb[7].mxu0  ;;  %2873 = vmatmul.mubr.msk.bf16.vlgmr.msra.gmra.mrb[0].mxu1 %vm464_vm0, %v425_v42 }
 0x112   :  { %v387_v53 = vmax.f32 %v273_v48, 0.0  ;;  %v276_v54 = vadd.f32 %v275_v52, %v3269_v29  ;;  %2905 = vmatpush3.bf16.msra.mxu1 %v2984_v28 }
 0x113   :  { %v390_v55 = vmax.f32 %v284_v51, 0.0  ;;  %2906 = vmatprep.subr.bf16.mxu1 %v2985_v47 }
 0x114   :  { %v388_v57 = vmax.f32 %v276_v54, 0.0 }
 0x115   :  { %v427_v58 = vpack.c.bf16 %v390_v55, %v389_v50 }
 0x116   :  { %v426_v59 = vpack.c.bf16 %v388_v57, %v387_v53  ;;  %v2842_v60 = vpop.f32.mrb[8].mxu0  ;;  %2907 = vmatpush3.bf16.msra.mxu1 %v2985_v47 }
 0x117   :  { %v297_v61 = vadd.f32 %v2842_v60, %v3269_v29  ;;  %v288_v62 = vpop.f32.mrb[9].mxu0  ;;  %2908 = vmatprep.subr.bf16.mxu1 %v2986_v56 }
 0x118   :  { %2876 = vmatprep.mubr.msk.bf16.mxu1 %vm464_vm0, %v426_v59  ;;  %v289_v0 = vadd.f32 %v288_v62, %v3269_v29  ;;  %v2843_v1 = vpop.f32.mrb[10].mxu0 }
 0x119   :  { %2877 = vmatmul.mubr.msk.bf16.gmra.mrb[4].mxu1 %vm464_vm0, %v427_v58  ;;  %v393_v2 = vmax.f32 %v297_v61, 0.0  ;;  %v300_v3 = vadd.f32 %v2843_v1, %v3269_v29  ;;  %v291_v4 = vpop.f32.mrb[11].mxu0 }
 0x11a   :  { %v391_v5 = vmax.f32 %v289_v0, 0.0  ;;  %v292_v6 = vadd.f32 %v291_v4, %v3269_v29  ;;  %2909 = vmatpush3.bf16.msra.mxu1 %v2986_v56 }
 0x11b   :  { %v394_v7 = vmax.f32 %v300_v3, 0.0  ;;  %2910 = vmatprep.subr.bf16.mxu1 %v2987_v63 }
 0x11c   :  { %v392_v9 = vmax.f32 %v292_v6, 0.0 }
 0x11d   :  { %v429_v10 = vpack.c.bf16 %v394_v7, %v393_v2 }
 0x11e   :  { %v428_v11 = vpack.c.bf16 %v392_v9, %v391_v5  ;;  %v2846_v12 = vpop.f32.mrb[12].mxu0  ;;  %2911 = vmatpush3.bf16.msra.mxu1 %v2987_v63 }
 0x11f   :  { %v313_v13 = vadd.f32 %v2846_v12, %v3269_v29  ;;  %v304_v14 = vpop.f32.mrb[13].mxu0  ;;  %2912 = vmatprep.subr.bf16.mxu1 %v2988_v8 }
 0x120   :  { %2880 = vmatprep.mubr.msk.bf16.mxu1 %vm464_vm0, %v428_v11  ;;  %v305_v16 = vadd.f32 %v304_v14, %v3269_v29  ;;  %v2847_v17 = vpop.f32.mrb[14].mxu0 }
 0x121   :  { %2881 = vmatmul.mubr.msk.bf16.gmra.mrb[8].mxu1 %vm464_vm0, %v429_v10  ;;  %v397_v18 = vmax.f32 %v313_v13, 0.0  ;;  %v316_v19 = vadd.f32 %v2847_v17, %v3269_v29  ;;  %v307_v20 = vpop.f32.mrb[15].mxu0 }
 0x122   :  { %v395_v21 = vmax.f32 %v305_v16, 0.0  ;;  %v308_v22 = vadd.f32 %v307_v20, %v3269_v29  ;;  %2913 = vmatpush3.bf16.msra.mxu1 %v2988_v8 }
 0x123   :  { %v398_v23 = vmax.f32 %v316_v19, 0.0  ;;  %2914 = vmatprep.subr.bf16.mxu1 %v2989_v15 }
 0x124   :  { %v396_v25 = vmax.f32 %v308_v22, 0.0  ;;  %v2992_v22 = vld [vmem:[#allocation2 + $0x140] ss:$8 sps:$4 sm:$0xff]  }
 0x125   :  { %v431_v26 = vpack.c.bf16 %v398_v23, %v397_v18  ;;  %v2994_v23 = vld [vmem:[#allocation2 + $0x144] ss:$8 sps:$4 sm:$0xff]  }
 0x126   :  { %v430_v27 = vpack.c.bf16 %v396_v25, %v395_v21  ;;  %v2850_v28 = vpop.f32.mrb[16].mxu0  ;;  %2915 = vmatpush3.bf16.msra.mxu1 %v2989_v15  ;;  %v2991_v21 = vld [vmem:[#allocation2 + $0x130] ss:$8 sps:$4 sm:$0xff]   ;;  %1105 = vmatprep.subr.bf16.mxu0 %v2994_v23 }
 0x127   :  { %v329_v30 = vadd.f32 %v2850_v28, %v3269_v29  ;;  %v320_v31 = vpop.f32.mrb[17].mxu0  ;;  %2916 = vmatprep.subr.bf16.mxu1 %v2990_v24  ;;  %1106 = vmatpush1.bf16.msra.mxu0 %v2992_v22  ;;  %v2995_v25 = vld [vmem:[#allocation2 + $0x150] ss:$8 sps:$4 sm:$0xff]  }
 0x128   :  { %2884 = vmatprep.mubr.msk.bf16.mxu1 %vm464_vm0, %v430_v27  ;;  %v321_v32 = vadd.f32 %v320_v31, %v3269_v29  ;;  %v2851_v33 = vpop.f32.mrb[18].mxu0  ;;  %v3003_v27 = vld [vmem:[#allocation2 + $0x174] ss:$8 sps:$4 sm:$0xff]   ;;  %v3001_v28 = vld [vmem:[#allocation2 + $0x170] ss:$8 sps:$4 sm:$0xff]  }
 0x129   :  { %2885 = vmatmul.mubr.msk.bf16.gmra.mrb[12].mxu1 %vm464_vm0, %v431_v26  ;;  %v401_v34 = vmax.f32 %v329_v30, 0.0  ;;  %v332_v35 = vadd.f32 %v2851_v33, %v3269_v29  ;;  %v323_v36 = vpop.f32.mrb[19].mxu0  ;;  %v3000_v26 = vld [vmem:[#allocation2 + $0x164] ss:$8 sps:$4 sm:$0xff]   ;;  %v3004_v31 = vld [vmem:[#allocation2 + $0x180] ss:$8 sps:$4 sm:$0xff]  }
 0x12a   :  { %v399_v37 = vmax.f32 %v321_v32, 0.0  ;;  %v324_v38 = vadd.f32 %v323_v36, %v3269_v29  ;;  %2917 = vmatpush3.bf16.msra.mxu1 %v2990_v24  ;;  %v2997_v24 = vld [vmem:[#allocation2 + $0x154] ss:$8 sps:$4 sm:$0xff]   ;;  %v3006_v30 = vld [vmem:[#allocation2 + $0x184] ss:$8 sps:$4 sm:$0xff]  }
 0x12b   :  { %v402_v39 = vmax.f32 %v332_v35, 0.0  ;;  %2918 = vmatprep.subr.bf16.mxu1 %v2991_v21  ;;  %1107 = vmatprep.subr.bf16.mxu0 %v2997_v24  ;;  %v3009_v32 = vld [vmem:[#allocation2 + $0x194] ss:$8 sps:$4 sm:$0xff]   ;;  %v3007_v33 = vld [vmem:[#allocation2 + $0x190] ss:$8 sps:$4 sm:$0xff]  }
 0x12c   :  { %v400_v40 = vmax.f32 %v324_v38, 0.0  ;;  %1108 = vmatpush1.bf16.msra.mxu0 %v2995_v25  ;;  %v3010_v35 = vld [vmem:[#allocation2 + $0x1a0] ss:$8 sps:$4 sm:$0xff]  }
 0x12d   :  { %v433_v41 = vpack.c.bf16 %v402_v39, %v401_v34  ;;  %1109 = vmatprep.subr.bf16.mxu0 %v3000_v26  ;;  %v3012_v34 = vld [vmem:[#allocation2 + $0x1a4] ss:$8 sps:$4 sm:$0xff]   ;;  %v3322_v36 = vld [vmem:[%s3561_s2 + $0x1] ss:$0 sm:$0xff] }
 0x12e   :  { %v432_v42 = vpack.c.bf16 %v400_v40, %v399_v37  ;;  %v2854_v43 = vpop.f32.mrb[20].mxu0  ;;  %2919 = vmatpush3.bf16.msra.mxu1 %v2991_v21 }
 0x12f   :  { %v345_v44 = vadd.f32 %v2854_v43, %v3269_v29  ;;  %v336_v45 = vpop.f32.mrb[21].mxu0 }
 0x130   :  { %2888 = vmatprep.mubr.msk.bf16.mxu1 %vm464_vm0, %v432_v42  ;;  %v337_v46 = vadd.f32 %v336_v45, %v3269_v29  ;;  %v2855_v47 = vpop.f32.mrb[22].mxu0 }
 0x131   :  { %2889 = vmatmul.mubr.msk.bf16.gmra.mrb[16].mxu1 %vm464_vm0, %v433_v41  ;;  %v405_v48 = vmax.f32 %v345_v44, 0.0  ;;  %v348_v49 = vadd.f32 %v2855_v47, %v3269_v29  ;;  %v339_v50 = vpop.f32.mrb[23].mxu0 }
 0x132   :  { %v403_v51 = vmax.f32 %v337_v46, 0.0  ;;  %v340_v52 = vadd.f32 %v339_v50, %v3269_v29 }
 0x133   :  { %v406_v53 = vmax.f32 %v348_v49, 0.0 }
 0x134   :  { %v404_v54 = vmax.f32 %v340_v52, 0.0 }
 0x135   :  { %v435_v55 = vpack.c.bf16 %v406_v53, %v405_v48 }
 0x136   :  { %v434_v56 = vpack.c.bf16 %v404_v54, %v403_v51  ;;  %v2858_v57 = vpop.f32.mrb[24].mxu0 }
 0x137   :  { %v361_v58 = vadd.f32 %v2858_v57, %v3269_v29  ;;  %v352_v59 = vpop.f32.mrb[25].mxu0 }
 0x138   :  { %2892 = vmatprep.mubr.msk.bf16.mxu1 %vm464_vm0, %v434_v56  ;;  %v353_v60 = vadd.f32 %v352_v59, %v3269_v29  ;;  %v2859_v61 = vpop.f32.mrb[26].mxu0 }
 0x139   :  { %2893 = vmatmul.mubr.msk.bf16.gmra.mrb[20].mxu1 %vm464_vm0, %v435_v55  ;;  %v409_v62 = vmax.f32 %v361_v58, 0.0  ;;  %v364_v63 = vadd.f32 %v2859_v61, %v3269_v29  ;;  %v355_v0 = vpop.f32.mrb[27].mxu0 }
 0x13a   :  { %v407_v1 = vmax.f32 %v353_v60, 0.0  ;;  %v356_v2 = vadd.f32 %v355_v0, %v3269_v29 }
 0x13b   :  { %v410_v3 = vmax.f32 %v364_v63, 0.0 }
 0x13c   :  { %v408_v4 = vmax.f32 %v356_v2, 0.0 }
 0x13d   :  { %v437_v5 = vpack.c.bf16 %v410_v3, %v409_v62 }
 0x13e   :  { %v436_v6 = vpack.c.bf16 %v408_v4, %v407_v1  ;;  %v2862_v7 = vpop.f32.mrb[28].mxu0 }
 0x13f   :  { %v377_v8 = vadd.f32 %v2862_v7, %v3269_v29  ;;  %v368_v9 = vpop.f32.mrb[29].mxu0 }
 0x140   :  { %2896 = vmatprep.mubr.msk.bf16.mxu1 %vm464_vm0, %v436_v6  ;;  %v369_v10 = vadd.f32 %v368_v9, %v3269_v29  ;;  %v2863_v11 = vpop.f32.mrb[30].mxu0 }
 0x141   :  { %2897 = vmatmul.mubr.msk.bf16.gmra.mrb[24].mxu1 %vm464_vm0, %v437_v5  ;;  %v413_v12 = vmax.f32 %v377_v8, 0.0  ;;  %v380_v13 = vadd.f32 %v2863_v11, %v3269_v29  ;;  %v371_v14 = vpop.f32.mrb[31].mxu0 }
 0x142   :  { %v411_v15 = vmax.f32 %v369_v10, 0.0  ;;  %v372_v16 = vadd.f32 %v371_v14, %v3269_v29  ;;  %v2998_v29 = vld [vmem:[#allocation2 + $0x160] ss:$8 sps:$4 sm:$0xff]  }
 0x143   :  { %v414_v17 = vmax.f32 %v380_v13, 0.0  ;;  %1110 = vmatpush1.bf16.msra.mxu0 %v2998_v29 }
 0x144   :  { %v412_v18 = vmax.f32 %v372_v16, 0.0  ;;  %1111 = vmatprep.subr.bf16.mxu0 %v3003_v27 }
 0x145   :  { %v439_v19 = vpack.c.bf16 %v414_v17, %v413_v12 }
 0x146   :  { %v438_v20 = vpack.c.bf16 %v412_v18, %v411_v15 }
 0x147   :  { %1112 = vmatpush1.bf16.msra.mxu0 %v3001_v28 }
 0x148   :  { %2900 = vmatprep.mubr.msk.bf16.mxu1 %vm464_vm0, %v438_v20  ;;  %1113 = vmatprep.subr.bf16.mxu0 %v3006_v30 }
 0x149   :  { %2901 = vmatmul.mubr.msk.bf16.gmra.mrb[28].mxu1 %vm464_vm0, %v439_v19 }
 0x14b   :  { %1114 = vmatpush1.bf16.msra.mxu0 %v3004_v31 }
 0x14c   :  { %1115 = vmatprep.subr.bf16.mxu0 %v3009_v32 }
 0x14f   :  { %1116 = vmatpush1.bf16.msra.mxu0 %v3007_v33 }
 0x150   :  { %1117 = vmatprep.subr.bf16.mxu0 %v3012_v34 }
 0x153   :  { %1118 = vmatpush1.bf16.msra.mxu0 %v3010_v35 }
 0x1e4   :  { %v2874_v37 = vpop.f32.mrb[0].mxu1 }
 0x1e5   :  { %v556_v38 = vadd.f32 %v2874_v37, %v3322_v36  ;;  %v547_v39 = vpop.f32.mrb[1].mxu1 }
 0x1e6   :  { %v548_v40 = vadd.f32 %v547_v39, %v3322_v36  ;;  %v2875_v41 = vpop.f32.mrb[2].mxu1 }
 0x1e7   :  { %v559_v42 = vadd.f32 %v2875_v41, %v3322_v36  ;;  %v550_v43 = vpop.f32.mrb[3].mxu1  ;;  %v676_v45 = vmax.f32 %v556_v38, 0.0 }
 0x1e8   :  { %v551_v44 = vadd.f32 %v550_v43, %v3322_v36  ;;  %v674_v47 = vmax.f32 %v548_v40, 0.0 }
 0x1e9   :  { %v677_v46 = vmax.f32 %v559_v42, 0.0 }
 0x1ea   :  { %v675_v48 = vmax.f32 %v551_v44, 0.0 }
 0x1eb   :  { %v724_v49 = vpack.c.bf16 %v677_v46, %v676_v45 }
 0x1ec   :  { %v723_v50 = vpack.c.bf16 %v675_v48, %v674_v47  ;;  %v2878_v51 = vpop.f32.mrb[4].mxu1 }
 0x1ed   :  { %v572_v52 = vadd.f32 %v2878_v51, %v3322_v36  ;;  %v563_v53 = vpop.f32.mrb[5].mxu1 }
 0x1ee   :  { %v564_v54 = vadd.f32 %v563_v53, %v3322_v36  ;;  %v2879_v55 = vpop.f32.mrb[6].mxu1  ;;  %2920 = vmatprep.mubr.bf16.mxu1 %v723_v50 }
 0x1ef   :  { %v680_v56 = vmax.f32 %v572_v52, 0.0  ;;  %v575_v57 = vadd.f32 %v2879_v55, %v3322_v36  ;;  %v566_v58 = vpop.f32.mrb[7].mxu1  ;;  %2921 = vmatmul.mubr.bf16.vlgmr.msra.gmra.mrb[32].mxu1 %v724_v49 }
 0x1f0   :  { %v678_v59 = vmax.f32 %v564_v54, 0.0  ;;  %v567_v60 = vadd.f32 %v566_v58, %v3322_v36 }
 0x1f1   :  { %v681_v61 = vmax.f32 %v575_v57, 0.0 }
 0x1f2   :  { %v679_v62 = vmax.f32 %v567_v60, 0.0 }
 0x1f3   :  { %v726_v63 = vpack.c.bf16 %v681_v61, %v680_v56 }
 0x1f4   :  { %v725_v0 = vpack.c.bf16 %v679_v62, %v678_v59  ;;  %v2882_v1 = vpop.f32.mrb[8].mxu1 }
 0x1f5   :  { %v588_v2 = vadd.f32 %v2882_v1, %v3322_v36  ;;  %v579_v3 = vpop.f32.mrb[9].mxu1 }
 0x1f6   :  { %2924 = vmatprep.mubr.bf16.mxu1 %v725_v0  ;;  %v580_v4 = vadd.f32 %v579_v3, %v3322_v36  ;;  %v2883_v5 = vpop.f32.mrb[10].mxu1 }
 0x1f7   :  { %2925 = vmatmul.mubr.bf16.gmra.mrb[36].mxu1 %v726_v63  ;;  %v684_v6 = vmax.f32 %v588_v2, 0.0  ;;  %v591_v7 = vadd.f32 %v2883_v5, %v3322_v36  ;;  %v582_v8 = vpop.f32.mrb[11].mxu1 }
 0x1f8   :  { %v682_v9 = vmax.f32 %v580_v4, 0.0  ;;  %v583_v10 = vadd.f32 %v582_v8, %v3322_v36 }
 0x1f9   :  { %v685_v11 = vmax.f32 %v591_v7, 0.0 }
 0x1fa   :  { %v683_v12 = vmax.f32 %v583_v10, 0.0 }
 0x1fb   :  { %v728_v13 = vpack.c.bf16 %v685_v11, %v684_v6 }
 0x1fc   :  { %v727_v14 = vpack.c.bf16 %v683_v12, %v682_v9  ;;  %v2886_v15 = vpop.f32.mrb[12].mxu1 }
 0x1fd   :  { %v604_v16 = vadd.f32 %v2886_v15, %v3322_v36  ;;  %v595_v17 = vpop.f32.mrb[13].mxu1 }
 0x1fe   :  { %2928 = vmatprep.mubr.bf16.mxu1 %v727_v14  ;;  %v596_v18 = vadd.f32 %v595_v17, %v3322_v36  ;;  %v2887_v19 = vpop.f32.mrb[14].mxu1 }
 0x1ff   :  { %2929 = vmatmul.mubr.bf16.gmra.mrb[40].mxu1 %v728_v13  ;;  %v688_v20 = vmax.f32 %v604_v16, 0.0  ;;  %v607_v21 = vadd.f32 %v2887_v19, %v3322_v36  ;;  %v598_v22 = vpop.f32.mrb[15].mxu1 }
 0x200   :  { %v686_v23 = vmax.f32 %v596_v18, 0.0  ;;  %v599_v24 = vadd.f32 %v598_v22, %v3322_v36  ;;  %v3013_v22 = vld [vmem:[#allocation2 + $0x1b0] ss:$8 sps:$4 sm:$0xff]  }
 0x201   :  { %v689_v25 = vmax.f32 %v607_v21, 0.0 }
 0x202   :  { %v687_v26 = vmax.f32 %v599_v24, 0.0  ;;  %v3185_v24 = vmov 0  }
 0x203   :  { %v730_v29 = vpack.c.bf16 %v689_v25, %v688_v20  ;;  %1137 = vmatprep.mubr.bf16.mxu0 %v3185_v24  ;;  %v3360_v25 = vld [vmem:[%s3561_s2 + $0x2] ss:$0 sm:$0xff] }
 0x204   :  { %v729_v27 = vpack.c.bf16 %v687_v26, %v686_v23  ;;  %v2890_v28 = vpop.f32.mrb[16].mxu1  ;;  %v3015_v23 = vld [vmem:[#allocation2 + $0x1b4] ss:$8 sps:$4 sm:$0xff]  }
 0x205   :  { %v620_v30 = vadd.f32 %v2890_v28, %v3322_v36  ;;  %v611_v31 = vpop.f32.mrb[17].mxu1  ;;  %1119 = vmatprep.subr.bf16.mxu0 %v3015_v23 }
 0x206   :  { %2932 = vmatprep.mubr.bf16.mxu1 %v729_v27  ;;  %v612_v32 = vadd.f32 %v611_v31, %v3322_v36  ;;  %v2891_v33 = vpop.f32.mrb[18].mxu1  ;;  %1120 = vmatpush1.bf16.msra.mxu0 %v3013_v22  ;;  %v3017_v31 = vld [vmem:[#allocation2 + $0x1c0] ss:$8 sps:$4 sm:$0xff]  }
 0x207   :  { %2933 = vmatmul.mubr.bf16.gmra.mrb[44].mxu1 %v730_v29  ;;  %v692_v34 = vmax.f32 %v620_v30, 0.0  ;;  %v623_v35 = vadd.f32 %v2891_v33, %v3322_v36  ;;  %v614_v37 = vpop.f32.mrb[19].mxu1  ;;  %v3016_v30 = vld [vmem:[#allocation2 + $0x240] ss:$8 sps:$4 sm:$0xff]  }
 0x208   :  { %v690_v38 = vmax.f32 %v612_v32, 0.0  ;;  %v615_v39 = vadd.f32 %v614_v37, %v3322_v36  ;;  %2704 = vmatprep.subr.bf16.mxu1 %v3016_v30 }
 0x209   :  { %v693_v40 = vmax.f32 %v623_v35, 0.0  ;;  %2705 = vmatpush3.bf16.msra.mxu1 %v3017_v31 }
 0x20a   :  { %v691_v41 = vmax.f32 %v615_v39, 0.0  ;;  %v3019_v39 = vld [vmem:[#allocation2 + $0x1d0] ss:$8 sps:$4 sm:$0xff]  }
 0x20b   :  { %v732_v42 = vpack.c.bf16 %v693_v40, %v692_v34  ;;  %v3018_v34 = vld [vmem:[#allocation2 + $0x250] ss:$8 sps:$4 sm:$0xff]  }
 0x20c   :  { %v731_v43 = vpack.c.bf16 %v691_v41, %v690_v38  ;;  %v2894_v44 = vpop.f32.mrb[20].mxu1  ;;  %2706 = vmatprep.subr.bf16.mxu1 %v3018_v34 }
 0x20d   :  { %v636_v45 = vadd.f32 %v2894_v44, %v3322_v36  ;;  %v627_v46 = vpop.f32.mrb[21].mxu1  ;;  %2707 = vmatpush3.bf16.msra.mxu1 %v3019_v39 }
 0x20e   :  { %2936 = vmatprep.mubr.bf16.mxu1 %v731_v43  ;;  %v628_v47 = vadd.f32 %v627_v46, %v3322_v36  ;;  %v2895_v48 = vpop.f32.mrb[22].mxu1 }
 0x20f   :  { %2937 = vmatmul.mubr.bf16.gmra.mrb[48].mxu1 %v732_v42  ;;  %v696_v49 = vmax.f32 %v636_v45, 0.0  ;;  %v639_v50 = vadd.f32 %v2895_v48, %v3322_v36  ;;  %v630_v51 = vpop.f32.mrb[23].mxu1  ;;  %v3020_v42 = vld [vmem:[#allocation2 + $0x260] ss:$8 sps:$4 sm:$0xff]  }
 0x210   :  { %v694_v52 = vmax.f32 %v628_v47, 0.0  ;;  %v631_v53 = vadd.f32 %v630_v51, %v3322_v36  ;;  %v3021_v48 = vld [vmem:[#allocation2 + $0x1e0] ss:$8 sps:$4 sm:$0xff]   ;;  %2708 = vmatprep.subr.bf16.mxu1 %v3020_v42  ;;  %v3022_v51 = vld [vmem:[#allocation2 + $0x270] ss:$8 sps:$4 sm:$0xff]  }
 0x211   :  { %v697_v54 = vmax.f32 %v639_v50, 0.0  ;;  %2709 = vmatpush3.bf16.msra.mxu1 %v3021_v48 }
 0x212   :  { %v695_v55 = vmax.f32 %v631_v53, 0.0  ;;  %2710 = vmatprep.subr.bf16.mxu1 %v3022_v51 }
 0x213   :  { %v734_v56 = vpack.c.bf16 %v697_v54, %v696_v49 }
 0x214   :  { %v733_v57 = vpack.c.bf16 %v695_v55, %v694_v52  ;;  %v2898_v58 = vpop.f32.mrb[24].mxu1 }
 0x215   :  { %v652_v59 = vadd.f32 %v2898_v58, %v3322_v36  ;;  %v643_v60 = vpop.f32.mrb[25].mxu1 }
 0x216   :  { %2940 = vmatprep.mubr.bf16.mxu1 %v733_v57  ;;  %v644_v61 = vadd.f32 %v643_v60, %v3322_v36  ;;  %v2899_v62 = vpop.f32.mrb[26].mxu1  ;;  %v3023_v57 = vld [vmem:[#allocation2 + $0x1f0] ss:$8 sps:$4 sm:$0xff]   ;;  %v3024_v60 = vld [vmem:[#allocation2 + $0x280] ss:$8 sps:$4 sm:$0xff]  }
 0x217   :  { %2941 = vmatmul.mubr.bf16.gmra.mrb[52].mxu1 %v734_v56  ;;  %v700_v63 = vmax.f32 %v652_v59, 0.0  ;;  %v655_v0 = vadd.f32 %v2899_v62, %v3322_v36  ;;  %v646_v1 = vpop.f32.mrb[27].mxu1 }
 0x218   :  { %v698_v2 = vmax.f32 %v644_v61, 0.0  ;;  %v647_v3 = vadd.f32 %v646_v1, %v3322_v36  ;;  %2711 = vmatpush3.bf16.msra.mxu1 %v3023_v57 }
 0x219   :  { %v701_v4 = vmax.f32 %v655_v0, 0.0  ;;  %2712 = vmatprep.subr.bf16.mxu1 %v3024_v60 }
 0x21a   :  { %v699_v5 = vmax.f32 %v647_v3, 0.0 }
 0x21b   :  { %v736_v6 = vpack.c.bf16 %v701_v4, %v700_v63 }
 0x21c   :  { %v735_v7 = vpack.c.bf16 %v699_v5, %v698_v2  ;;  %v2902_v8 = vpop.f32.mrb[28].mxu1  ;;  %v3025_v2 = vld [vmem:[#allocation2 + $0x200] ss:$8 sps:$4 sm:$0xff]   ;;  %v3026_v5 = vld [vmem:[#allocation2 + $0x290] ss:$8 sps:$4 sm:$0xff]  }
 0x21d   :  { %v668_v9 = vadd.f32 %v2902_v8, %v3322_v36  ;;  %v659_v10 = vpop.f32.mrb[29].mxu1  ;;  %2713 = vmatpush3.bf16.msra.mxu1 %v3025_v2 }
 0x21e   :  { %2944 = vmatprep.mubr.bf16.mxu1 %v735_v7  ;;  %v660_v11 = vadd.f32 %v659_v10, %v3322_v36  ;;  %v2903_v12 = vpop.f32.mrb[30].mxu1  ;;  %2714 = vmatprep.subr.bf16.mxu1 %v3026_v5 }
 0x21f   :  { %2945 = vmatmul.mubr.bf16.gmra.mrb[56].mxu1 %v736_v6  ;;  %v704_v13 = vmax.f32 %v668_v9, 0.0  ;;  %v671_v14 = vadd.f32 %v2903_v12, %v3322_v36  ;;  %v662_v15 = vpop.f32.mrb[31].mxu1  ;;  %v3027_v12 = vld [vmem:[#allocation2 + $0x210] ss:$8 sps:$4 sm:$0xff]  }
 0x220   :  { %v702_v16 = vmax.f32 %v660_v11, 0.0  ;;  %v663_v17 = vadd.f32 %v662_v15, %v3322_v36 }
 0x221   :  { %v705_v18 = vmax.f32 %v671_v14, 0.0  ;;  %v3028_v14 = vld [vmem:[#allocation2 + $0x2a0] ss:$8 sps:$4 sm:$0xff]   ;;  %2715 = vmatpush3.bf16.msra.mxu1 %v3027_v12 }
 0x222   :  { %v703_v19 = vmax.f32 %v663_v17, 0.0  ;;  %2716 = vmatprep.subr.bf16.mxu1 %v3028_v14 }
 0x223   :  { %v738_v20 = vpack.c.bf16 %v705_v18, %v704_v13 }
 0x224   :  { %v737_v21 = vpack.c.bf16 %v703_v19, %v702_v16 }
 0x226   :  { %2948 = vmatprep.mubr.bf16.mxu1 %v737_v21 }
 0x227   :  { %2949 = vmatmul.mubr.bf16.gmra.mrb[60].mxu1 %v738_v20  ;;  %v3029_v20 = vld [vmem:[#allocation2 + $0x220] ss:$8 sps:$4 sm:$0xff]  }
 0x228   :  { %2717 = vmatpush3.bf16.msra.mxu1 %v3029_v20 }
 0x2c2   :  { %v2922_v26 = vpop.f32.mrb[32].mxu1 }
 0x2c3   :  { %v830_v36 = vadd.f32 %v2922_v26, %v3360_v25  ;;  %v821_v29 = vpop.f32.mrb[33].mxu1 }
 0x2c4   :  { %v822_v27 = vadd.f32 %v821_v29, %v3360_v25  ;;  %v2923_v28 = vpop.f32.mrb[34].mxu1 }
 0x2c5   :  { %v833_v32 = vadd.f32 %v2923_v28, %v3360_v25  ;;  %v824_v33 = vpop.f32.mrb[35].mxu1  ;;  %v950_v37 = vmax.f32 %v830_v36, 0.0 }
 0x2c6   :  { %v825_v35 = vadd.f32 %v824_v33, %v3360_v25  ;;  %v948_v40 = vmax.f32 %v822_v27, 0.0 }
 0x2c7   :  { %v951_v38 = vmax.f32 %v833_v32, 0.0 }
 0x2c8   :  { %v949_v41 = vmax.f32 %v825_v35, 0.0 }
 0x2c9   :  { %v999_v43 = vpack.c.bf16 %v951_v38, %v950_v37 }
 0x2ca   :  { %v998_v44 = vpack.c.bf16 %v949_v41, %v948_v40  ;;  %v2926_v45 = vpop.f32.mrb[36].mxu1 }
 0x2cb   :  { %v846_v46 = vadd.f32 %v2926_v45, %v3360_v25  ;;  %v837_v47 = vpop.f32.mrb[37].mxu1 }
 0x2cc   :  { %v838_v49 = vadd.f32 %v837_v47, %v3360_v25  ;;  %v2927_v50 = vpop.f32.mrb[38].mxu1  ;;  %1138 = vmatmul.mubr.bf16.vlgmr.msra.gmra.mrb[32].mxu0 %v998_v44 }
 0x2cd   :  { %v849_v52 = vadd.f32 %v2927_v50, %v3360_v25  ;;  %v840_v53 = vpop.f32.mrb[39].mxu1  ;;  %1147 = vmatprep.mubr.bf16.mxu0 %v3185_v24  ;;  %v954_v55 = vmax.f32 %v846_v46, 0.0 }
 0x2ce   :  { %v841_v54 = vadd.f32 %v840_v53, %v3360_v25  ;;  %v952_v58 = vmax.f32 %v838_v49, 0.0 }
 0x2cf   :  { %v955_v56 = vmax.f32 %v849_v52, 0.0 }
 0x2d0   :  { %v953_v59 = vmax.f32 %v841_v54, 0.0 }
 0x2d1   :  { %v1001_v61 = vpack.c.bf16 %v955_v56, %v954_v55 }
 0x2d2   :  { %v1000_v62 = vpack.c.bf16 %v953_v59, %v952_v58  ;;  %v2930_v63 = vpop.f32.mrb[40].mxu1 }
 0x2d3   :  { %v862_v0 = vadd.f32 %v2930_v63, %v3360_v25  ;;  %v853_v1 = vpop.f32.mrb[41].mxu1 }
 0x2d4   :  { %1148 = vmatmul.mubr.bf16.gmra.mrb[36].mxu0 %v999_v43  ;;  %v854_v3 = vadd.f32 %v853_v1, %v3360_v25  ;;  %v2931_v4 = vpop.f32.mrb[42].mxu1 }
 0x2d5   :  { %v958_v6 = vmax.f32 %v862_v0, 0.0  ;;  %v865_v7 = vadd.f32 %v2931_v4, %v3360_v25  ;;  %v856_v8 = vpop.f32.mrb[43].mxu1  ;;  %1157 = vmatprep.mubr.bf16.mxu0 %v3185_v24 }
 0x2d6   :  { %v956_v9 = vmax.f32 %v854_v3, 0.0  ;;  %v857_v10 = vadd.f32 %v856_v8, %v3360_v25 }
 0x2d7   :  { %v959_v11 = vmax.f32 %v865_v7, 0.0 }
 0x2d8   :  { %v957_v13 = vmax.f32 %v857_v10, 0.0 }
 0x2d9   :  { %v1003_v15 = vpack.c.bf16 %v959_v11, %v958_v6 }
 0x2da   :  { %v1002_v16 = vpack.c.bf16 %v957_v13, %v956_v9  ;;  %v2934_v17 = vpop.f32.mrb[44].mxu1 }
 0x2db   :  { %v878_v18 = vadd.f32 %v2934_v17, %v3360_v25  ;;  %v869_v19 = vpop.f32.mrb[45].mxu1 }
 0x2dc   :  { %1158 = vmatmul.mubr.bf16.gmra.mrb[40].mxu0 %v1000_v62  ;;  %v870_v21 = vadd.f32 %v869_v19, %v3360_v25  ;;  %v2935_v22 = vpop.f32.mrb[46].mxu1 }
 0x2dd   :  { %1167 = vmatprep.mubr.bf16.mxu0 %v3185_v24  ;;  %v962_v23 = vmax.f32 %v878_v18, 0.0  ;;  %v881_v26 = vadd.f32 %v2935_v22, %v3360_v25  ;;  %v872_v36 = vpop.f32.mrb[47].mxu1 }
 0x2de   :  { %v960_v29 = vmax.f32 %v870_v21, 0.0  ;;  %v873_v27 = vadd.f32 %v872_v36, %v3360_v25 }
 0x2df   :  { %v963_v28 = vmax.f32 %v881_v26, 0.0 }
 0x2e0   :  { %v961_v30 = vmax.f32 %v873_v27, 0.0  ;;  %v1015_v27 = vlaneseq }
 0x2e1   :  { %v3381_v31 = vpack.c.bf16 %v963_v28, %v962_v23 }
 0x2e2   :  { %v1004_v32 = vpack.c.bf16 %v961_v30, %v960_v29  ;;  %v2938_v33 = vpop.f32.mrb[48].mxu1  ;;  %v3030_v29 = vld [vmem:[#allocation2 + $0x2b0] ss:$8 sps:$4 sm:$0xff]   ;;  %v1016_v28 = vshrl.u32 %v1015_v27, 7 }
 0x2e3   :  { %v894_v34 = vadd.f32 %v2938_v33, %v3360_v25  ;;  %v885_v35 = vpop.f32.mrb[49].mxu1  ;;  %2718 = vmatprep.subr.bf16.mxu1 %v3030_v29 }
 0x2e4   :  { %1168 = vmatmul.mubr.bf16.gmra.mrb[44].mxu0 %v1001_v61  ;;  %v886_v37 = vadd.f32 %v885_v35, %v3360_v25  ;;  %v2939_v38 = vpop.f32.mrb[50].mxu1  ;;  %v3414_v30 = vsub.s32 0, %v1016_v28 }
 0x2e5   :  { %1177 = vmatprep.mubr.bf16.mxu0 %v3185_v24  ;;  %v966_v39 = vmax.f32 %v894_v34, 0.0  ;;  %v897_v40 = vadd.f32 %v2939_v38, %v3360_v25  ;;  %v888_v41 = vpop.f32.mrb[51].mxu1 }
 0x2e6   :  { %v964_v42 = vmax.f32 %v886_v37, 0.0  ;;  %v889_v43 = vadd.f32 %v888_v41, %v3360_v25 }
 0x2e7   :  { %v967_v44 = vmax.f32 %v897_v40, 0.0 }
 0x2e8   :  { %v965_v45 = vmax.f32 %v889_v43, 0.0 }
 0x2e9   :  { %v1007_v46 = vpack.c.bf16 %v967_v44, %v966_v39 }
 0x2ea   :  { %v1006_v47 = vpack.c.bf16 %v965_v45, %v964_v42  ;;  %v2942_v48 = vpop.f32.mrb[52].mxu1 }
 0x2eb   :  { %v910_v49 = vadd.f32 %v2942_v48, %v3360_v25  ;;  %v901_v50 = vpop.f32.mrb[53].mxu1 }
 0x2ec   :  { %1178 = vmatmul.mubr.bf16.gmra.mrb[48].mxu0 %v1002_v16  ;;  %v902_v51 = vadd.f32 %v901_v50, %v3360_v25  ;;  %v2943_v52 = vpop.f32.mrb[54].mxu1 }
 0x2ed   :  { %1187 = vmatprep.mubr.bf16.mxu0 %v3185_v24  ;;  %v970_v53 = vmax.f32 %v910_v49, 0.0  ;;  %v913_v54 = vadd.f32 %v2943_v52, %v3360_v25  ;;  %v904_v55 = vpop.f32.mrb[55].mxu1 }
 0x2ee   :  { %v968_v56 = vmax.f32 %v902_v51, 0.0  ;;  %v905_v57 = vadd.f32 %v904_v55, %v3360_v25 }
 0x2ef   :  { %v971_v58 = vmax.f32 %v913_v54, 0.0 }
 0x2f0   :  { %v969_v59 = vmax.f32 %v905_v57, 0.0 }
 0x2f1   :  { %v1009_v60 = vpack.c.bf16 %v971_v58, %v970_v53 }
 0x2f2   :  { %v1008_v61 = vpack.c.bf16 %v969_v59, %v968_v56  ;;  %v2946_v62 = vpop.f32.mrb[56].mxu1 }
 0x2f3   :  { %v926_v63 = vadd.f32 %v2946_v62, %v3360_v25  ;;  %v917_v0 = vpop.f32.mrb[57].mxu1 }
 0x2f4   :  { %1188 = vmatmul.mubr.bf16.gmra.mrb[52].mxu0 %v1003_v15  ;;  %v918_v1 = vadd.f32 %v917_v0, %v3360_v25  ;;  %v2947_v2 = vpop.f32.mrb[58].mxu1 }
 0x2f5   :  { %1197 = vmatprep.mubr.bf16.mxu0 %v3185_v24  ;;  %v974_v3 = vmax.f32 %v926_v63, 0.0  ;;  %v929_v4 = vadd.f32 %v2947_v2, %v3360_v25  ;;  %v920_v5 = vpop.f32.mrb[59].mxu1 }
 0x2f6   :  { %v972_v6 = vmax.f32 %v918_v1, 0.0  ;;  %v921_v7 = vadd.f32 %v920_v5, %v3360_v25 }
 0x2f7   :  { %v975_v8 = vmax.f32 %v929_v4, 0.0 }
 0x2f8   :  { %v973_v9 = vmax.f32 %v921_v7, 0.0 }
 0x2f9   :  { %v1011_v10 = vpack.c.bf16 %v975_v8, %v974_v3 }
 0x2fa   :  { %v1010_v11 = vpack.c.bf16 %v973_v9, %v972_v6  ;;  %v2950_v12 = vpop.f32.mrb[60].mxu1 }
 0x2fb   :  { %v942_v13 = vadd.f32 %v2950_v12, %v3360_v25  ;;  %v933_v14 = vpop.f32.mrb[61].mxu1 }
 0x2fc   :  { %1198 = vmatmul.mubr.bf16.gmra.mrb[56].mxu0 %v1004_v32  ;;  %v934_v15 = vadd.f32 %v933_v14, %v3360_v25  ;;  %v2951_v16 = vpop.f32.mrb[62].mxu1  ;;  %v3419_v32 = vsub.s32 1, %v1016_v28 }
 0x2fd   :  { %1207 = vmatprep.mubr.bf16.mxu0 %v3185_v24  ;;  %v978_v17 = vmax.f32 %v942_v13, 0.0  ;;  %v945_v18 = vadd.f32 %v2951_v16, %v3360_v25  ;;  %v936_v19 = vpop.f32.mrb[63].mxu1 }
 0x2fe   :  { %v976_v20 = vmax.f32 %v934_v15, 0.0  ;;  %v937_v21 = vadd.f32 %v936_v19, %v3360_v25  ;;  %v3031_v25 = vld [vmem:[#allocation2 + $0x230] ss:$8 sps:$4 sm:$0xff]  }
 0x2ff   :  { %v979_v22 = vmax.f32 %v945_v18, 0.0  ;;  %2719 = vmatpush3.bf16.msra.mxu1 %v3031_v25 }
 0x300   :  { %v977_v23 = vmax.f32 %v937_v21, 0.0 }
 0x301   :  { %v1013_v26 = vpack.c.bf16 %v979_v22, %v978_v17 }
 0x302   :  { %v1012_v36 = vpack.c.bf16 %v977_v23, %v976_v20 }
 0x304   :  { %1208 = vmatmul.mubr.bf16.gmra.mrb[60].mxu0 %v3381_v31  ;;  %v2519_v31 = vld [vmem:[%s3561_s2 + $0x3] ss:$8 sm:$0x3] }
 0x305   :  { %1217 = vmatprep.mubr.bf16.mxu0 %v3185_v24  ;;  %v3422_v33 = vrot.slane %v2519_v31, %v3414_v30  ;;  %v3425_v34 = vrot.slane %v2519_v31, %v3419_v32 }
 0x30c   :  { %1218 = vmatmul.mubr.bf16.gmra.mrb[64].mxu0 %v1006_v47 }
 0x30d   :  { %1227 = vmatprep.mubr.bf16.mxu0 %v3185_v24 }
 0x314   :  { %1228 = vmatmul.mubr.bf16.gmra.mrb[68].mxu0 %v1007_v46 }
 0x315   :  { %1237 = vmatprep.mubr.bf16.mxu0 %v3185_v24 }
 0x31c   :  { %1238 = vmatmul.mubr.bf16.gmra.mrb[72].mxu0 %v1008_v61 }
 0x31d   :  { %1247 = vmatprep.mubr.bf16.mxu0 %v3185_v24 }
 0x324   :  { %1248 = vmatmul.mubr.bf16.gmra.mrb[76].mxu0 %v1009_v60 }
 0x325   :  { %1257 = vmatprep.mubr.bf16.mxu0 %v3185_v24 }
 0x32c   :  { %1258 = vmatmul.mubr.bf16.gmra.mrb[80].mxu0 %v1010_v11 }
 0x32d   :  { %1267 = vmatprep.mubr.bf16.mxu0 %v3185_v24 }
 0x334   :  { %1268 = vmatmul.mubr.bf16.gmra.mrb[84].mxu0 %v1011_v10 }
 0x335   :  { %1277 = vmatprep.mubr.bf16.mxu0 %v3185_v24 }
 0x33c   :  { %1278 = vmatmul.mubr.bf16.gmra.mrb[88].mxu0 %v1012_v36 }
 0x33d   :  { %1287 = vmatprep.mubr.bf16.mxu0 %v3185_v24 }
 0x344   :  { %1288 = vmatmul.mubr.bf16.gmra.mrb[92].mxu0 %v1013_v26 }
 0x345   :  { %1934 = vmatprep.mubr.bf16.mxu0 %v3185_v24 }
 0x39f   :  { %v1139_v35 = vpop.f32.mrb[32].mxu0 }
 0x3a0   :  { %v1140_v24 = vadd.f32 %v1139_v35, %v3422_v33  ;;  %v1141_v37 = vpop.f32.mrb[33].mxu0 }
 0x3a1   :  { %v1142_v38 = vadd.f32 %v1141_v37, %v3425_v34  ;;  %v1143_v39 = vpop.f32.mrb[34].mxu0 }
 0x3a2   :  { %v1144_v40 = vadd.f32 %v1143_v39, %v3422_v33  ;;  %v1145_v41 = vpop.f32.mrb[35].mxu0  ;;  %v1298_v43 = vmax.f32 %v1140_v24, 0.0 }
 0x3a3   :  { %v1146_v42 = vadd.f32 %v1145_v41, %v3425_v34  ;;  %v1299_v45 = vmax.f32 %v1142_v38, 0.0 }
 0x3a4   :  { %v1300_v44 = vmax.f32 %v1144_v40, 0.0 }
 0x3a5   :  { %v1301_v46 = vmax.f32 %v1146_v42, 0.0 }
 0x3a6   :  { %v1395_v47 = vpack.c.bf16 %v1300_v44, %v1298_v43 }
 0x3a7   :  { %v1396_v48 = vpack.c.bf16 %v1301_v46, %v1299_v45  ;;  %v1149_v49 = vpop.f32.mrb[36].mxu0 }
 0x3a8   :  { %v1150_v50 = vadd.f32 %v1149_v49, %v3422_v33  ;;  %v1151_v51 = vpop.f32.mrb[37].mxu0 }
 0x3a9   :  { %v1152_v52 = vadd.f32 %v1151_v51, %v3425_v34  ;;  %v1153_v53 = vpop.f32.mrb[38].mxu0  ;;  %1555 = vmatprep.mubr.bf16.mxu1 %v1396_v48 }
 0x3aa   :  { %v1154_v54 = vadd.f32 %v1153_v53, %v3422_v33  ;;  %v1155_v55 = vpop.f32.mrb[39].mxu0  ;;  %1556 = vmatmul.mubr.bf16.vlgmr.msra.gmra.mrb[64].mxu1 %v1395_v47  ;;  %v1302_v57 = vmax.f32 %v1150_v50, 0.0 }
 0x3ab   :  { %v1156_v56 = vadd.f32 %v1155_v55, %v3425_v34  ;;  %v1303_v59 = vmax.f32 %v1152_v52, 0.0 }
 0x3ac   :  { %v1304_v58 = vmax.f32 %v1154_v54, 0.0 }
 0x3ad   :  { %v1305_v60 = vmax.f32 %v1156_v56, 0.0 }
 0x3ae   :  { %v1397_v61 = vpack.c.bf16 %v1304_v58, %v1302_v57 }
 0x3af   :  { %v1398_v62 = vpack.c.bf16 %v1305_v60, %v1303_v59  ;;  %v1159_v63 = vpop.f32.mrb[40].mxu0 }
 0x3b0   :  { %v1160_v0 = vadd.f32 %v1159_v63, %v3422_v33  ;;  %v1161_v1 = vpop.f32.mrb[41].mxu0 }
 0x3b1   :  { %v1162_v2 = vadd.f32 %v1161_v1, %v3425_v34  ;;  %v1163_v3 = vpop.f32.mrb[42].mxu0  ;;  %1563 = vmatprep.mubr.bf16.mxu1 %v1398_v62 }
 0x3b2   :  { %v1164_v4 = vadd.f32 %v1163_v3, %v3422_v33  ;;  %v1165_v5 = vpop.f32.mrb[43].mxu0  ;;  %1564 = vmatmul.mubr.bf16.gmra.mrb[68].mxu1 %v1397_v61  ;;  %v1306_v7 = vmax.f32 %v1160_v0, 0.0 }
 0x3b3   :  { %v1166_v6 = vadd.f32 %v1165_v5, %v3425_v34  ;;  %v1307_v9 = vmax.f32 %v1162_v2, 0.0 }
 0x3b4   :  { %v1308_v8 = vmax.f32 %v1164_v4, 0.0 }
 0x3b5   :  { %v1309_v10 = vmax.f32 %v1166_v6, 0.0 }
 0x3b6   :  { %v1399_v11 = vpack.c.bf16 %v1308_v8, %v1306_v7 }
 0x3b7   :  { %v1400_v12 = vpack.c.bf16 %v1309_v10, %v1307_v9  ;;  %v1169_v13 = vpop.f32.mrb[44].mxu0 }
 0x3b8   :  { %v1170_v14 = vadd.f32 %v1169_v13, %v3422_v33  ;;  %v1171_v15 = vpop.f32.mrb[45].mxu0 }
 0x3b9   :  { %v1172_v16 = vadd.f32 %v1171_v15, %v3425_v34  ;;  %v1173_v17 = vpop.f32.mrb[46].mxu0  ;;  %1571 = vmatprep.mubr.bf16.mxu1 %v1400_v12 }
 0x3ba   :  { %v1174_v18 = vadd.f32 %v1173_v17, %v3422_v33  ;;  %v1175_v19 = vpop.f32.mrb[47].mxu0  ;;  %1572 = vmatmul.mubr.bf16.gmra.mrb[72].mxu1 %v1399_v11  ;;  %v1310_v21 = vmax.f32 %v1170_v14, 0.0 }
 0x3bb   :  { %v1176_v20 = vadd.f32 %v1175_v19, %v3425_v34  ;;  %v1311_v23 = vmax.f32 %v1172_v16, 0.0 }
 0x3bc   :  { %v1312_v22 = vmax.f32 %v1174_v18, 0.0 }
 0x3bd   :  { %v1313_v26 = vmax.f32 %v1176_v20, 0.0 }
 0x3be   :  { %v1401_v36 = vpack.c.bf16 %v1312_v22, %v1310_v21 }
 0x3bf   :  { %v1402_v29 = vpack.c.bf16 %v1313_v26, %v1311_v23  ;;  %v1179_v25 = vpop.f32.mrb[48].mxu0 }
 0x3c0   :  { %v1180_v28 = vadd.f32 %v1179_v25, %v3422_v33  ;;  %v1181_v31 = vpop.f32.mrb[49].mxu0 }
 0x3c1   :  { %v1182_v35 = vadd.f32 %v1181_v31, %v3425_v34  ;;  %v1183_v24 = vpop.f32.mrb[50].mxu0  ;;  %1579 = vmatprep.mubr.bf16.mxu1 %v1402_v29 }
 0x3c2   :  { %v1184_v37 = vadd.f32 %v1183_v24, %v3422_v33  ;;  %v1185_v38 = vpop.f32.mrb[51].mxu0  ;;  %1580 = vmatmul.mubr.bf16.gmra.mrb[76].mxu1 %v1401_v36  ;;  %v1314_v40 = vmax.f32 %v1180_v28, 0.0 }
 0x3c3   :  { %v1186_v39 = vadd.f32 %v1185_v38, %v3425_v34  ;;  %v1315_v42 = vmax.f32 %v1182_v35, 0.0 }
 0x3c4   :  { %v1316_v41 = vmax.f32 %v1184_v37, 0.0 }
 0x3c5   :  { %v1317_v43 = vmax.f32 %v1186_v39, 0.0 }
 0x3c6   :  { %v1403_v44 = vpack.c.bf16 %v1316_v41, %v1314_v40 }
 0x3c7   :  { %v1404_v45 = vpack.c.bf16 %v1317_v43, %v1315_v42  ;;  %v1189_v46 = vpop.f32.mrb[52].mxu0 }
 0x3c8   :  { %v1190_v47 = vadd.f32 %v1189_v46, %v3422_v33  ;;  %v1191_v48 = vpop.f32.mrb[53].mxu0 }
 0x3c9   :  { %v1192_v49 = vadd.f32 %v1191_v48, %v3425_v34  ;;  %v1193_v50 = vpop.f32.mrb[54].mxu0  ;;  %1587 = vmatprep.mubr.bf16.mxu1 %v1404_v45 }
 0x3ca   :  { %v1194_v51 = vadd.f32 %v1193_v50, %v3422_v33  ;;  %v1195_v52 = vpop.f32.mrb[55].mxu0  ;;  %1588 = vmatmul.mubr.bf16.gmra.mrb[80].mxu1 %v1403_v44  ;;  %v1318_v54 = vmax.f32 %v1190_v47, 0.0 }
 0x3cb   :  { %v1196_v53 = vadd.f32 %v1195_v52, %v3425_v34  ;;  %v1319_v56 = vmax.f32 %v1192_v49, 0.0 }
 0x3cc   :  { %v1320_v55 = vmax.f32 %v1194_v51, 0.0 }
 0x3cd   :  { %v1321_v57 = vmax.f32 %v1196_v53, 0.0 }
 0x3ce   :  { %v1405_v58 = vpack.c.bf16 %v1320_v55, %v1318_v54 }
 0x3cf   :  { %v1406_v59 = vpack.c.bf16 %v1321_v57, %v1319_v56  ;;  %v1199_v60 = vpop.f32.mrb[56].mxu0 }
 0x3d0   :  { %v1200_v61 = vadd.f32 %v1199_v60, %v3422_v33  ;;  %v1201_v62 = vpop.f32.mrb[57].mxu0 }
 0x3d1   :  { %v1202_v63 = vadd.f32 %v1201_v62, %v3425_v34  ;;  %v1203_v0 = vpop.f32.mrb[58].mxu0  ;;  %1595 = vmatprep.mubr.bf16.mxu1 %v1406_v59 }
 0x3d2   :  { %v1204_v1 = vadd.f32 %v1203_v0, %v3422_v33  ;;  %v1205_v2 = vpop.f32.mrb[59].mxu0  ;;  %1596 = vmatmul.mubr.bf16.gmra.mrb[84].mxu1 %v1405_v58  ;;  %v1322_v4 = vmax.f32 %v1200_v61, 0.0 }
 0x3d3   :  { %v1206_v3 = vadd.f32 %v1205_v2, %v3425_v34  ;;  %v1323_v6 = vmax.f32 %v1202_v63, 0.0 }
 0x3d4   :  { %v1324_v5 = vmax.f32 %v1204_v1, 0.0 }
 0x3d5   :  { %v1325_v7 = vmax.f32 %v1206_v3, 0.0 }
 0x3d6   :  { %v1407_v8 = vpack.c.bf16 %v1324_v5, %v1322_v4 }
 0x3d7   :  { %v1408_v9 = vpack.c.bf16 %v1325_v7, %v1323_v6  ;;  %v1209_v10 = vpop.f32.mrb[60].mxu0 }
 0x3d8   :  { %v1210_v11 = vadd.f32 %v1209_v10, %v3422_v33  ;;  %v1211_v12 = vpop.f32.mrb[61].mxu0 }
 0x3d9   :  { %v1212_v13 = vadd.f32 %v1211_v12, %v3425_v34  ;;  %v1213_v14 = vpop.f32.mrb[62].mxu0  ;;  %1603 = vmatprep.mubr.bf16.mxu1 %v1408_v9 }
 0x3da   :  { %v1214_v15 = vadd.f32 %v1213_v14, %v3422_v33  ;;  %v1215_v16 = vpop.f32.mrb[63].mxu0  ;;  %1604 = vmatmul.mubr.bf16.gmra.mrb[88].mxu1 %v1407_v8  ;;  %v1326_v18 = vmax.f32 %v1210_v11, 0.0 }
 0x3db   :  { %v1216_v17 = vadd.f32 %v1215_v16, %v3425_v34  ;;  %v1327_v20 = vmax.f32 %v1212_v13, 0.0 }
 0x3dc   :  { %v1328_v19 = vmax.f32 %v1214_v15, 0.0 }
 0x3dd   :  { %v1329_v21 = vmax.f32 %v1216_v17, 0.0 }
 0x3de   :  { %v1409_v22 = vpack.c.bf16 %v1328_v19, %v1326_v18 }
 0x3df   :  { %v1410_v23 = vpack.c.bf16 %v1329_v21, %v1327_v20  ;;  %v1219_v26 = vpop.f32.mrb[64].mxu0 }
 0x3e0   :  { %v1220_v36 = vadd.f32 %v1219_v26, %v3422_v33  ;;  %v1221_v29 = vpop.f32.mrb[65].mxu0 }
 0x3e1   :  { %v1222_v25 = vadd.f32 %v1221_v29, %v3425_v34  ;;  %v1223_v28 = vpop.f32.mrb[66].mxu0  ;;  %1611 = vmatprep.mubr.bf16.mxu1 %v1410_v23 }
 0x3e2   :  { %v1224_v31 = vadd.f32 %v1223_v28, %v3422_v33  ;;  %v1225_v35 = vpop.f32.mrb[67].mxu0  ;;  %1612 = vmatmul.mubr.bf16.gmra.mrb[92].mxu1 %v1409_v22  ;;  %v1330_v37 = vmax.f32 %v1220_v36, 0.0 }
 0x3e3   :  { %v1226_v24 = vadd.f32 %v1225_v35, %v3425_v34  ;;  %v1331_v39 = vmax.f32 %v1222_v25, 0.0 }
 0x3e4   :  { %v1332_v38 = vmax.f32 %v1224_v31, 0.0 }
 0x3e5   :  { %v1333_v40 = vmax.f32 %v1226_v24, 0.0 }
 0x3e6   :  { %v1411_v41 = vpack.c.bf16 %v1332_v38, %v1330_v37 }
 0x3e7   :  { %v1412_v42 = vpack.c.bf16 %v1333_v40, %v1331_v39  ;;  %v1229_v43 = vpop.f32.mrb[68].mxu0 }
 0x3e8   :  { %v1230_v44 = vadd.f32 %v1229_v43, %v3422_v33  ;;  %v1231_v45 = vpop.f32.mrb[69].mxu0 }
 0x3e9   :  { %v1232_v46 = vadd.f32 %v1231_v45, %v3425_v34  ;;  %v1233_v47 = vpop.f32.mrb[70].mxu0  ;;  %1619 = vmatprep.mubr.bf16.mxu1 %v1412_v42 }
 0x3ea   :  { %v1234_v48 = vadd.f32 %v1233_v47, %v3422_v33  ;;  %v1235_v49 = vpop.f32.mrb[71].mxu0  ;;  %1620 = vmatmul.mubr.bf16.gmra.mrb[96].mxu1 %v1411_v41  ;;  %v1334_v51 = vmax.f32 %v1230_v44, 0.0 }
 0x3eb   :  { %v1236_v50 = vadd.f32 %v1235_v49, %v3425_v34  ;;  %v1335_v53 = vmax.f32 %v1232_v46, 0.0 }
 0x3ec   :  { %v1336_v52 = vmax.f32 %v1234_v48, 0.0 }
 0x3ed   :  { %v1337_v54 = vmax.f32 %v1236_v50, 0.0 }
 0x3ee   :  { %v1413_v55 = vpack.c.bf16 %v1336_v52, %v1334_v51 }
 0x3ef   :  { %v1414_v56 = vpack.c.bf16 %v1337_v54, %v1335_v53  ;;  %v1239_v57 = vpop.f32.mrb[72].mxu0 }
 0x3f0   :  { %v1240_v58 = vadd.f32 %v1239_v57, %v3422_v33  ;;  %v1241_v59 = vpop.f32.mrb[73].mxu0 }
 0x3f1   :  { %v1242_v60 = vadd.f32 %v1241_v59, %v3425_v34  ;;  %v1243_v61 = vpop.f32.mrb[74].mxu0  ;;  %1627 = vmatprep.mubr.bf16.mxu1 %v1414_v56 }
 0x3f2   :  { %v1244_v62 = vadd.f32 %v1243_v61, %v3422_v33  ;;  %v1245_v63 = vpop.f32.mrb[75].mxu0  ;;  %1628 = vmatmul.mubr.bf16.gmra.mrb[100].mxu1 %v1413_v55  ;;  %v1338_v1 = vmax.f32 %v1240_v58, 0.0 }
 0x3f3   :  { %v1246_v0 = vadd.f32 %v1245_v63, %v3425_v34  ;;  %v1339_v3 = vmax.f32 %v1242_v60, 0.0 }
 0x3f4   :  { %v1340_v2 = vmax.f32 %v1244_v62, 0.0 }
 0x3f5   :  { %v1341_v4 = vmax.f32 %v1246_v0, 0.0 }
 0x3f6   :  { %v1415_v5 = vpack.c.bf16 %v1340_v2, %v1338_v1  ;;  %v3032_v2 = vld [vmem:[#allocation2 + $0x2c0] ss:$8 sps:$4 sm:$0xff]  }
 0x3f7   :  { %v1416_v6 = vpack.c.bf16 %v1341_v4, %v1339_v3  ;;  %v1249_v7 = vpop.f32.mrb[76].mxu0  ;;  %v3034_v3 = vld [vmem:[#allocation2 + $0x2c4] ss:$8 sps:$4 sm:$0xff]  }
 0x3f8   :  { %v1250_v8 = vadd.f32 %v1249_v7, %v3422_v33  ;;  %v1251_v9 = vpop.f32.mrb[77].mxu0  ;;  %1902 = vmatprep.subr.bf16.mxu0 %v3034_v3 }
 0x3f9   :  { %v1252_v10 = vadd.f32 %v1251_v9, %v3425_v34  ;;  %v1253_v11 = vpop.f32.mrb[78].mxu0  ;;  %1635 = vmatprep.mubr.bf16.mxu1 %v1416_v6  ;;  %1903 = vmatpush1.bf16.msra.mxu0 %v3032_v2 }
 0x3fa   :  { %v1254_v12 = vadd.f32 %v1253_v11, %v3422_v33  ;;  %v1255_v13 = vpop.f32.mrb[79].mxu0  ;;  %1636 = vmatmul.mubr.bf16.gmra.mrb[104].mxu1 %v1415_v5  ;;  %v1342_v15 = vmax.f32 %v1250_v8, 0.0 }
 0x3fb   :  { %v1256_v14 = vadd.f32 %v1255_v13, %v3425_v34  ;;  %v1343_v17 = vmax.f32 %v1252_v10, 0.0 }
 0x3fc   :  { %v1344_v16 = vmax.f32 %v1254_v12, 0.0 }
 0x3fd   :  { %v1345_v18 = vmax.f32 %v1256_v14, 0.0 }
 0x3fe   :  { %v1417_v19 = vpack.c.bf16 %v1344_v16, %v1342_v15 }
 0x3ff   :  { %v1418_v20 = vpack.c.bf16 %v1345_v18, %v1343_v17  ;;  %v1259_v21 = vpop.f32.mrb[80].mxu0 }
 0x400   :  { %v1260_v22 = vadd.f32 %v1259_v21, %v3422_v33  ;;  %v1261_v23 = vpop.f32.mrb[81].mxu0  ;;  %v3037_v21 = vld [vmem:[#allocation2 + $0x2d4] ss:$8 sps:$4 sm:$0xff]  }
 0x401   :  { %v1262_v26 = vadd.f32 %v1261_v23, %v3425_v34  ;;  %v1263_v36 = vpop.f32.mrb[82].mxu0  ;;  %1643 = vmatprep.mubr.bf16.mxu1 %v1418_v20  ;;  %v3035_v20 = vld [vmem:[#allocation2 + $0x2d0] ss:$8 sps:$4 sm:$0xff]   ;;  %1904 = vmatprep.subr.bf16.mxu0 %v3037_v21  ;;  %v3040_v23 = vld [vmem:[#allocation2 + $0x2e4] ss:$8 sps:$4 sm:$0xff]  }
 0x402   :  { %v1264_v29 = vadd.f32 %v1263_v36, %v3422_v33  ;;  %v1265_v25 = vpop.f32.mrb[83].mxu0  ;;  %1644 = vmatmul.mubr.bf16.gmra.mrb[108].mxu1 %v1417_v19  ;;  %v1346_v31 = vmax.f32 %v1260_v22, 0.0  ;;  %1905 = vmatpush1.bf16.msra.mxu0 %v3035_v20  ;;  %v3038_v22 = vld [vmem:[#allocation2 + $0x2e0] ss:$8 sps:$4 sm:$0xff]   ;;  %v3046_v36 = vld [vmem:[#allocation2 + $0x304] ss:$8 sps:$4 sm:$0xff]  }
 0x403   :  { %v1266_v28 = vadd.f32 %v1265_v25, %v3425_v34  ;;  %v1347_v24 = vmax.f32 %v1262_v26, 0.0  ;;  %1906 = vmatprep.subr.bf16.mxu0 %v3040_v23  ;;  %v3043_v26 = vld [vmem:[#allocation2 + $0x2f4] ss:$8 sps:$4 sm:$0xff]  }
 0x404   :  { %v1348_v35 = vmax.f32 %v1264_v29, 0.0  ;;  %v3047_v29 = vld [vmem:[#allocation2 + $0x310] ss:$8 sps:$4 sm:$0xff]   ;;  %v3049_v25 = vld [vmem:[#allocation2 + $0x314] ss:$8 sps:$4 sm:$0xff]  }
 0x405   :  { %v1349_v37 = vmax.f32 %v1266_v28, 0.0  ;;  %v3050_v28 = vld [vmem:[#allocation2 + $0x320] ss:$8 sps:$4 sm:$0xff]  }
 0x406   :  { %v1419_v38 = vpack.c.bf16 %v1348_v35, %v1346_v31  ;;  %1907 = vmatpush1.bf16.msra.mxu0 %v3038_v22  ;;  %v3052_v31 = vld [vmem:[#allocation2 + $0x324] ss:$8 sps:$4 sm:$0xff]  }
 0x407   :  { %v1420_v39 = vpack.c.bf16 %v1349_v37, %v1347_v24  ;;  %v1269_v40 = vpop.f32.mrb[84].mxu0  ;;  %1908 = vmatprep.subr.bf16.mxu0 %v3043_v26 }
 0x408   :  { %v1270_v41 = vadd.f32 %v1269_v40, %v3422_v33  ;;  %v1271_v42 = vpop.f32.mrb[85].mxu0 }
 0x409   :  { %v1272_v43 = vadd.f32 %v1271_v42, %v3425_v34  ;;  %v1273_v44 = vpop.f32.mrb[86].mxu0  ;;  %1651 = vmatprep.mubr.bf16.mxu1 %v1420_v39  ;;  %v3494_v39 = vld [vmem:[%s3561_s2 + $0x4] ss:$0 sm:$0xff] }
 0x40a   :  { %v1274_v45 = vadd.f32 %v1273_v44, %v3422_v33  ;;  %v1275_v46 = vpop.f32.mrb[87].mxu0  ;;  %1652 = vmatmul.mubr.bf16.gmra.mrb[112].mxu1 %v1419_v38  ;;  %v1350_v48 = vmax.f32 %v1270_v41, 0.0 }
 0x40b   :  { %v1276_v47 = vadd.f32 %v1275_v46, %v3425_v34  ;;  %v1351_v50 = vmax.f32 %v1272_v43, 0.0 }
 0x40c   :  { %v1352_v49 = vmax.f32 %v1274_v45, 0.0 }
 0x40d   :  { %v1353_v51 = vmax.f32 %v1276_v47, 0.0 }
 0x40e   :  { %v1421_v52 = vpack.c.bf16 %v1352_v49, %v1350_v48  ;;  %v3053_v49 = vld [vmem:[#allocation2 + $0x330] ss:$8 sps:$4 sm:$0xff]  }
 0x40f   :  { %v1422_v53 = vpack.c.bf16 %v1353_v51, %v1351_v50  ;;  %v1279_v54 = vpop.f32.mrb[88].mxu0  ;;  %v3055_v50 = vld [vmem:[#allocation2 + $0x334] ss:$8 sps:$4 sm:$0xff]  }
 0x410   :  { %v1280_v55 = vadd.f32 %v1279_v54, %v3422_v33  ;;  %v1281_v56 = vpop.f32.mrb[89].mxu0 }
 0x411   :  { %v1282_v57 = vadd.f32 %v1281_v56, %v3425_v34  ;;  %v1283_v58 = vpop.f32.mrb[90].mxu0  ;;  %1659 = vmatprep.mubr.bf16.mxu1 %v1422_v53 }
 0x412   :  { %v1284_v59 = vadd.f32 %v1283_v58, %v3422_v33  ;;  %v1285_v60 = vpop.f32.mrb[91].mxu0  ;;  %1660 = vmatmul.mubr.bf16.gmra.mrb[116].mxu1 %v1421_v52  ;;  %v1354_v62 = vmax.f32 %v1280_v55, 0.0 }
 0x413   :  { %v1286_v61 = vadd.f32 %v1285_v60, %v3425_v34  ;;  %v1355_v0 = vmax.f32 %v1282_v57, 0.0 }
 0x414   :  { %v1356_v63 = vmax.f32 %v1284_v59, 0.0 }
 0x415   :  { %v1357_v1 = vmax.f32 %v1286_v61, 0.0 }
 0x416   :  { %v1423_v4 = vpack.c.bf16 %v1356_v63, %v1354_v62 }
 0x417   :  { %v1424_v5 = vpack.c.bf16 %v1357_v1, %v1355_v0  ;;  %v1289_v6 = vpop.f32.mrb[92].mxu0 }
 0x418   :  { %v1290_v7 = vadd.f32 %v1289_v6, %v3422_v33  ;;  %v1291_v8 = vpop.f32.mrb[93].mxu0 }
 0x419   :  { %v1292_v9 = vadd.f32 %v1291_v8, %v3425_v34  ;;  %v1293_v10 = vpop.f32.mrb[94].mxu0  ;;  %1667 = vmatprep.mubr.bf16.mxu1 %v1424_v5 }
 0x41a   :  { %v1294_v11 = vadd.f32 %v1293_v10, %v3422_v33  ;;  %v1295_v12 = vpop.f32.mrb[95].mxu0  ;;  %1668 = vmatmul.mubr.bf16.gmra.mrb[120].mxu1 %v1423_v4  ;;  %v1358_v14 = vmax.f32 %v1290_v7, 0.0  ;;  %v3041_v33 = vld [vmem:[#allocation2 + $0x2f0] ss:$8 sps:$4 sm:$0xff]  }
 0x41b   :  { %v1296_v13 = vadd.f32 %v1295_v12, %v3425_v34  ;;  %v1359_v16 = vmax.f32 %v1292_v9, 0.0  ;;  %1909 = vmatpush1.bf16.msra.mxu0 %v3041_v33  ;;  %v3044_v34 = vld [vmem:[#allocation2 + $0x300] ss:$8 sps:$4 sm:$0xff]  }
 0x41c   :  { %v1360_v15 = vmax.f32 %v1294_v11, 0.0  ;;  %1910 = vmatprep.subr.bf16.mxu0 %v3046_v36 }
 0x41d   :  { %v1361_v17 = vmax.f32 %v1296_v13, 0.0 }
 0x41e   :  { %v1425_v18 = vpack.c.bf16 %v1360_v15, %v1358_v14 }
 0x41f   :  { %v1426_v19 = vpack.c.bf16 %v1361_v17, %v1359_v16  ;;  %1911 = vmatpush1.bf16.msra.mxu0 %v3044_v34 }
 0x420   :  { %1912 = vmatprep.subr.bf16.mxu0 %v3049_v25 }
 0x421   :  { %1675 = vmatprep.mubr.bf16.mxu1 %v1426_v19 }
 0x422   :  { %1676 = vmatmul.mubr.bf16.gmra.mrb[124].mxu1 %v1425_v18 }
 0x423   :  { %1913 = vmatpush1.bf16.msra.mxu0 %v3047_v29 }
 0x424   :  { %1914 = vmatprep.subr.bf16.mxu0 %v3052_v31 }
 0x427   :  { %1915 = vmatpush1.bf16.msra.mxu0 %v3050_v28 }
 0x428   :  { %1916 = vmatprep.subr.bf16.mxu0 %v3055_v50 }
 0x42b   :  { %1917 = vmatpush1.bf16.msra.mxu0 %v3053_v49 }
 0x47d   :  { %v2720_v35 = vpop.f32.mrb[64].mxu1 }
 0x47e   :  { %v2721_v24 = vpop.f32.mrb[65].mxu1 }
 0x47f   :  { %v2722_v37 = vadd.f32 %v2721_v24, %v2720_v35  ;;  %v2723_v38 = vpop.f32.mrb[66].mxu1 }
 0x480   :  { %v2724_v40 = vpop.f32.mrb[67].mxu1 }
 0x481   :  { %v2725_v41 = vadd.f32 %v2724_v40, %v2723_v38  ;;  %v1558_v42 = vadd.f32 %v2722_v37, %v3494_v39 }
 0x483   :  { %v1561_v43 = vadd.f32 %v2725_v41, %v3494_v39 }
 0x485   :  { %v1684_v44 = vmax.f32 %v1558_v42, %v1561_v43  ;;  %v2726_v45 = vpop.f32.mrb[68].mxu1 }
 0x486   :  { %v2727_v46 = vpop.f32.mrb[69].mxu1 }
 0x487   :  { %v2728_v47 = vadd.f32 %v2727_v46, %v2726_v45  ;;  %v2729_v48 = vpop.f32.mrb[70].mxu1 }
 0x488   :  { %v2730_v51 = vpop.f32.mrb[71].mxu1 }
 0x489   :  { %v1566_v52 = vadd.f32 %v2728_v47, %v3494_v39  ;;  %v2731_v53 = vadd.f32 %v2730_v51, %v2729_v48 }
 0x48b   :  { %v1685_v54 = vmax.f32 %v1684_v44, %v1566_v52  ;;  %v1569_v55 = vadd.f32 %v2731_v53, %v3494_v39 }
 0x48d   :  { %v1686_v56 = vmax.f32 %v1685_v54, %v1569_v55  ;;  %v2732_v57 = vpop.f32.mrb[72].mxu1 }
 0x48e   :  { %v2733_v58 = vpop.f32.mrb[73].mxu1 }
 0x48f   :  { %v2734_v59 = vadd.f32 %v2733_v58, %v2732_v57  ;;  %v2735_v60 = vpop.f32.mrb[74].mxu1 }
 0x490   :  { %v2736_v61 = vpop.f32.mrb[75].mxu1 }
 0x491   :  { %v1574_v62 = vadd.f32 %v2734_v59, %v3494_v39  ;;  %v2737_v63 = vadd.f32 %v2736_v61, %v2735_v60 }
 0x493   :  { %v1687_v0 = vmax.f32 %v1686_v56, %v1574_v62  ;;  %v1577_v1 = vadd.f32 %v2737_v63, %v3494_v39 }
 0x495   :  { %v1688_v2 = vmax.f32 %v1687_v0, %v1577_v1  ;;  %v2738_v3 = vpop.f32.mrb[76].mxu1 }
 0x496   :  { %v2739_v4 = vpop.f32.mrb[77].mxu1 }
 0x497   :  { %v2740_v5 = vadd.f32 %v2739_v4, %v2738_v3  ;;  %v2741_v6 = vpop.f32.mrb[78].mxu1 }
 0x498   :  { %v2742_v7 = vpop.f32.mrb[79].mxu1 }
 0x499   :  { %v1582_v8 = vadd.f32 %v2740_v5, %v3494_v39  ;;  %v2743_v9 = vadd.f32 %v2742_v7, %v2741_v6 }
 0x49b   :  { %v1689_v10 = vmax.f32 %v1688_v2, %v1582_v8  ;;  %v1585_v11 = vadd.f32 %v2743_v9, %v3494_v39 }
 0x49d   :  { %v1690_v12 = vmax.f32 %v1689_v10, %v1585_v11  ;;  %v2744_v13 = vpop.f32.mrb[80].mxu1 }
 0x49e   :  { %v2745_v14 = vpop.f32.mrb[81].mxu1 }
 0x49f   :  { %v2746_v15 = vadd.f32 %v2745_v14, %v2744_v13  ;;  %v2747_v16 = vpop.f32.mrb[82].mxu1  ;;  %v1691_v43 = vrot.slane %v1690_v12, 4 }
 0x4a0   :  { %v2748_v17 = vpop.f32.mrb[83].mxu1 }
 0x4a1   :  { %v2749_v18 = vadd.f32 %v2748_v17, %v2747_v16  ;;  %v1590_v19 = vadd.f32 %v2746_v15, %v3494_v39  ;;  %v1692_v49 = vmax.f32 %v1690_v12, %v1691_v43 }
 0x4a3   :  { %v1593_v20 = vadd.f32 %v2749_v18, %v3494_v39  ;;  %v1693_v55 = vrot.slane %v1692_v49, 2 }
 0x4a5   :  { %v1697_v21 = vmax.f32 %v1590_v19, %v1593_v20  ;;  %v2750_v22 = vpop.f32.mrb[84].mxu1  ;;  %v1694_v61 = vmax.f32 %v1692_v49, %v1693_v55 }
 0x4a6   :  { %v2751_v23 = vpop.f32.mrb[85].mxu1 }
 0x4a7   :  { %v2752_v33 = vadd.f32 %v2751_v23, %v2750_v22  ;;  %v2753_v26 = vpop.f32.mrb[86].mxu1  ;;  %v1695_v7 = vrot.slane %v1694_v61, 1 }
 0x4a8   :  { %v2754_v34 = vpop.f32.mrb[87].mxu1 }
 0x4a9   :  { %v1598_v36 = vadd.f32 %v2752_v33, %v3494_v39  ;;  %v2755_v29 = vadd.f32 %v2754_v34, %v2753_v26  ;;  %v1696_v14 = vmax.f32 %v1694_v61, %v1695_v7 }
 0x4ab   :  { %v1698_v25 = vmax.f32 %v1697_v21, %v1598_v36  ;;  %v1601_v28 = vadd.f32 %v2755_v29, %v3494_v39  ;;  %v1736_v22 = vmul.f32 %v1696_v14, %v1696_v14 }
 0x4ad   :  { %v1699_v31 = vmax.f32 %v1698_v25, %v1601_v28  ;;  %v2756_v35 = vpop.f32.mrb[88].mxu1 }
 0x4ae   :  { %v2757_v24 = vpop.f32.mrb[89].mxu1 }
 0x4af   :  { %v2758_v37 = vadd.f32 %v2757_v24, %v2756_v35  ;;  %v2759_v38 = vpop.f32.mrb[90].mxu1 }
 0x4b0   :  { %v2760_v40 = vpop.f32.mrb[91].mxu1 }
 0x4b1   :  { %v1606_v41 = vadd.f32 %v2758_v37, %v3494_v39  ;;  %v2761_v42 = vadd.f32 %v2760_v40, %v2759_v38 }
 0x4b3   :  { %v1700_v44 = vmax.f32 %v1699_v31, %v1606_v41  ;;  %v1609_v45 = vadd.f32 %v2761_v42, %v3494_v39 }
 0x4b5   :  { %v1701_v46 = vmax.f32 %v1700_v44, %v1609_v45  ;;  %v2762_v47 = vpop.f32.mrb[92].mxu1 }
 0x4b6   :  { %v2763_v48 = vpop.f32.mrb[93].mxu1 }
 0x4b7   :  { %v2764_v50 = vadd.f32 %v2763_v48, %v2762_v47  ;;  %v2765_v51 = vpop.f32.mrb[94].mxu1 }
 0x4b8   :  { %v2766_v52 = vpop.f32.mrb[95].mxu1 }
 0x4b9   :  { %v1614_v53 = vadd.f32 %v2764_v50, %v3494_v39  ;;  %v2767_v54 = vadd.f32 %v2766_v52, %v2765_v51 }
 0x4bb   :  { %v1702_v56 = vmax.f32 %v1701_v46, %v1614_v53  ;;  %v1617_v57 = vadd.f32 %v2767_v54, %v3494_v39 }
 0x4bd   :  { %v1703_v58 = vmax.f32 %v1702_v56, %v1617_v57  ;;  %v2768_v59 = vpop.f32.mrb[96].mxu1 }
 0x4be   :  { %v2769_v60 = vpop.f32.mrb[97].mxu1 }
 0x4bf   :  { %v1704_v62 = vrot.slane %v1703_v58, 4  ;;  %v2770_v63 = vadd.f32 %v2769_v60, %v2768_v59  ;;  %v2771_v0 = vpop.f32.mrb[98].mxu1 }
 0x4c0   :  { %v2772_v1 = vpop.f32.mrb[99].mxu1 }
 0x4c1   :  { %v1705_v2 = vmax.f32 %v1703_v58, %v1704_v62  ;;  %v2773_v3 = vadd.f32 %v2772_v1, %v2771_v0  ;;  %v1622_v5 = vadd.f32 %v2770_v63, %v3494_v39 }
 0x4c3   :  { %v1706_v4 = vrot.slane %v1705_v2, 2  ;;  %v1625_v6 = vadd.f32 %v2773_v3, %v3494_v39 }
 0x4c5   :  { %v1707_v8 = vmax.f32 %v1705_v2, %v1706_v4  ;;  %v1710_v9 = vmax.f32 %v1622_v5, %v1625_v6  ;;  %v2774_v10 = vpop.f32.mrb[100].mxu1 }
 0x4c6   :  { %v2775_v11 = vpop.f32.mrb[101].mxu1 }
 0x4c7   :  { %v2776_v12 = vadd.f32 %v2775_v11, %v2774_v10  ;;  %v2777_v13 = vpop.f32.mrb[102].mxu1  ;;  %v1708_v15 = vrot.slane %v1707_v8, 1 }
 0x4c8   :  { %v2778_v16 = vpop.f32.mrb[103].mxu1 }
 0x4c9   :  { %v1630_v17 = vadd.f32 %v2776_v12, %v3494_v39  ;;  %v2779_v18 = vadd.f32 %v2778_v16, %v2777_v13  ;;  %v3515_v19 = vmax.f32 %v1707_v8, %v1708_v15  ;;  %v3056_v12 = vld [vmem:[#allocation2 + $0x340] ss:$8 sps:$4 sm:$0xff]   ;;  %v3058_v13 = vld [vmem:[#allocation2 + $0x344] ss:$8 sps:$4 sm:$0xff]  }
 0x4ca   :  { %2152 = vmatprep.subr.bf16.mxu1 %v3058_v13  ;;  %v3091_v13 = vld [vmem:[#allocation2 + $0x3f4] ss:$8 sps:$4 sm:$0xff]  }
 0x4cb   :  { %v1711_v20 = vmax.f32 %v1710_v9, %v1630_v17  ;;  %v1633_v21 = vadd.f32 %v2779_v18, %v3494_v39  ;;  %v1737_v23 = vmul.f32 %v3515_v19, %v3515_v19  ;;  %v3061_v17 = vld [vmem:[#allocation2 + $0x354] ss:$8 sps:$4 sm:$0xff]   ;;  %2153 = vmatpush1.bf16.msra.mxu1 %v3056_v12  ;;  %v3086_v12 = vld [vmem:[#allocation2 + $0x3e0] ss:$8 sps:$4 sm:$0xff]  }
 0x4cc   :  { %2154 = vmatprep.subr.bf16.mxu1 %v3061_v17  ;;  %v3092_v17 = vld [vmem:[#allocation2 + $0x400] ss:$8 sps:$4 sm:$0xff]  }
 0x4cd   :  { %v1712_v33 = vmax.f32 %v1711_v20, %v1633_v21  ;;  %v2780_v26 = vpop.f32.mrb[104].mxu1  ;;  %v1741_v34 = vsel %vm1740_vm1, %v1737_v23, %v1736_v22  ;;  %v3059_v22 = vld [vmem:[#allocation2 + $0x350] ss:$8 sps:$4 sm:$0xff]  }
 0x4ce   :  { %v2781_v36 = vpop.f32.mrb[105].mxu1  ;;  %v1744_v29 = vsel %vm1743_vm2, %v1741_v34, 0.0 }
 0x4cf   :  { %v2782_v25 = vadd.f32 %v2781_v36, %v2780_v26  ;;  %v2783_v28 = vpop.f32.mrb[106].mxu1  ;;  %1745 = vadd.xlane.f32.xlu0 %v1744_v29  ;;  %2155 = vmatpush1.bf16.msra.mxu1 %v3059_v22  ;;  %v3062_v29 = vld [vmem:[#allocation2 + $0x360] ss:$8 sps:$4 sm:$0xff]  }
 0x4d0   :  { %v2784_v31 = vpop.f32.mrb[107].mxu1  ;;  %v3098_v22 = vld [vmem:[#allocation2 + $0x420] ss:$8 sps:$4 sm:$0xff]  }
 0x4d1   :  { %v1638_v35 = vadd.f32 %v2782_v25, %v3494_v39  ;;  %v2785_v24 = vadd.f32 %v2784_v31, %v2783_v28  ;;  %v3067_v25 = vld [vmem:[#allocation2 + $0x374] ss:$8 sps:$4 sm:$0xff]  }
 0x4d3   :  { %v1713_v37 = vmax.f32 %v1712_v33, %v1638_v35  ;;  %v1641_v38 = vadd.f32 %v2785_v24, %v3494_v39  ;;  %v3064_v33 = vld [vmem:[#allocation2 + $0x364] ss:$8 sps:$4 sm:$0xff]  }
 0x4d4   :  { %2156 = vmatprep.subr.bf16.mxu1 %v3064_v33  ;;  %v3101_v33 = vld [vmem:[#allocation2 + $0x430] ss:$8 sps:$4 sm:$0xff]  }
 0x4d5   :  { %v1714_v40 = vmax.f32 %v1713_v37, %v1641_v38  ;;  %v2786_v41 = vpop.f32.mrb[108].mxu1  ;;  %2157 = vmatpush1.bf16.msra.mxu1 %v3062_v29  ;;  %v3065_v38 = vld [vmem:[#allocation2 + $0x370] ss:$8 sps:$4 sm:$0xff]   ;;  %v3112_v29 = vld [vmem:[#allocation2 + $0x464] ss:$8 sps:$4 sm:$0xff]  }
 0x4d6   :  { %v2787_v42 = vpop.f32.mrb[109].mxu1  ;;  %2158 = vmatprep.subr.bf16.mxu1 %v3067_v25  ;;  %v3110_v25 = vld [vmem:[#allocation2 + $0x460] ss:$8 sps:$4 sm:$0xff]  }
 0x4d7   :  { %v2788_v43 = vadd.f32 %v2787_v42, %v2786_v41  ;;  %v2789_v44 = vpop.f32.mrb[110].mxu1  ;;  %v3070_v41 = vld [vmem:[#allocation2 + $0x384] ss:$8 sps:$4 sm:$0xff]  }
 0x4d8   :  { %v2790_v45 = vpop.f32.mrb[111].mxu1 }
 0x4d9   :  { %v1646_v46 = vadd.f32 %v2788_v43, %v3494_v39  ;;  %v2791_v47 = vadd.f32 %v2790_v45, %v2789_v44  ;;  %2159 = vmatpush1.bf16.msra.mxu1 %v3065_v38  ;;  %v3119_v38 = vld [vmem:[#allocation2 + $0x490] ss:$8 sps:$4 sm:$0xff]  }
 0x4da   :  { %2160 = vmatprep.subr.bf16.mxu1 %v3070_v41  ;;  %v3122_v41 = vld [vmem:[#allocation2 + $0x4a0] ss:$8 sps:$4 sm:$0xff]  }
 0x4db   :  { %v1715_v48 = vmax.f32 %v1714_v40, %v1646_v46  ;;  %v1649_v49 = vadd.f32 %v2791_v47, %v3494_v39  ;;  %v3068_v46 = vld [vmem:[#allocation2 + $0x380] ss:$8 sps:$4 sm:$0xff]   ;;  %v3073_v47 = vld [vmem:[#allocation2 + $0x394] ss:$8 sps:$4 sm:$0xff]  }
 0x4dd   :  { %v1716_v50 = vmax.f32 %v1715_v48, %v1649_v49  ;;  %v2792_v51 = vpop.f32.mrb[112].mxu1  ;;  %2161 = vmatpush1.bf16.msra.mxu1 %v3068_v46  ;;  %v3133_v46 = vld [vmem:[#allocation2 + $0x4d4] ss:$8 sps:$4 sm:$0xff]  }
 0x4de   :  { %v2793_v52 = vpop.f32.mrb[113].mxu1  ;;  %2162 = vmatprep.subr.bf16.mxu1 %v3073_v47  ;;  %v3131_v47 = vld [vmem:[#allocation2 + $0x4d0] ss:$8 sps:$4 sm:$0xff]  }
 0x4df   :  { %v1717_v53 = vrot.slane %v1716_v50, 4  ;;  %v2794_v54 = vadd.f32 %v2793_v52, %v2792_v51  ;;  %v2795_v55 = vpop.f32.mrb[114].mxu1 }
 0x4e0   :  { %v2796_v56 = vpop.f32.mrb[115].mxu1 }
 0x4e1   :  { %v1718_v57 = vmax.f32 %v1716_v50, %v1717_v53  ;;  %v2797_v58 = vadd.f32 %v2796_v56, %v2795_v55  ;;  %v1654_v60 = vadd.f32 %v2794_v54, %v3494_v39  ;;  %v3071_v50 = vld [vmem:[#allocation2 + $0x390] ss:$8 sps:$4 sm:$0xff]  }
 0x4e2   :  { %2163 = vmatpush1.bf16.msra.mxu1 %v3071_v50  ;;  %v3139_v50 = vld [vmem:[#allocation2 + $0x4f4] ss:$8 sps:$4 sm:$0xff]  }
 0x4e3   :  { %v1719_v59 = vrot.slane %v1718_v57, 2  ;;  %v1657_v61 = vadd.f32 %v2797_v58, %v3494_v39 }
 0x4e5   :  { %v1720_v62 = vmax.f32 %v1718_v57, %v1719_v59  ;;  %v1723_v63 = vmax.f32 %v1654_v60, %v1657_v61  ;;  %v2798_v0 = vpop.f32.mrb[116].mxu1 }
 0x4e6   :  { %v2799_v1 = vpop.f32.mrb[117].mxu1 }
 0x4e7   :  { %v1721_v2 = vrot.slane %v1720_v62, 1  ;;  %v2800_v3 = vadd.f32 %v2799_v1, %v2798_v0  ;;  %v2801_v4 = vpop.f32.mrb[118].mxu1 }
 0x4e8   :  { %v2802_v5 = vpop.f32.mrb[119].mxu1 }
 0x4e9   :  { %v1662_v6 = vadd.f32 %v2800_v3, %v3494_v39  ;;  %v2803_v7 = vadd.f32 %v2802_v5, %v2801_v4  ;;  %v1722_v8 = vmax.f32 %v1720_v62, %v1721_v2  ;;  %v3076_v4 = vld [vmem:[#allocation2 + $0x3a4] ss:$8 sps:$4 sm:$0xff]   ;;  %v3079_v5 = vld [vmem:[#allocation2 + $0x3b4] ss:$8 sps:$4 sm:$0xff]  }
 0x4ea   :  { %2164 = vmatprep.subr.bf16.mxu1 %v3076_v4  ;;  %v3146_v4 = vld [vmem:[#allocation2 + $0x520] ss:$8 sps:$4 sm:$0xff]  }
 0x4eb   :  { %v1724_v9 = vmax.f32 %v1723_v63, %v1662_v6  ;;  %v1665_v10 = vadd.f32 %v2803_v7, %v3494_v39  ;;  %v1770_v11 = vmul.f32 %v1722_v8, %v1696_v14  ;;  %v1802_v56 = vpack.c.bf16 %v1722_v8, %v1722_v8  ;;  %v3077_v6 = vld [vmem:[#allocation2 + $0x3b0] ss:$8 sps:$4 sm:$0xff]   ;;  %v3082_v7 = vld [vmem:[#allocation2 + $0x3c4] ss:$8 sps:$4 sm:$0xff]  }
 0x4ed   :  { %v1725_v15 = vmax.f32 %v1724_v9, %v1665_v10  ;;  %v2804_v16 = vpop.f32.mrb[120].mxu1  ;;  %v1817_v61 = vunpack.c.l.b16 %v1802_v56  ;;  %v3085_v9 = vld [vmem:[#allocation2 + $0x3d4] ss:$8 sps:$4 sm:$0xff]   ;;  %v3083_v10 = vld [vmem:[#allocation2 + $0x3d0] ss:$8 sps:$4 sm:$0xff]  }
 0x4ee   :  { %v2805_v18 = vpop.f32.mrb[121].mxu1  ;;  %v2552_v56 = vld [vmem:[%s3561_s2 + $0x5] ss:$8 sm:$0x3] }
 0x4ef   :  { %v2806_v20 = vadd.f32 %v2805_v18, %v2804_v16  ;;  %v2807_v21 = vpop.f32.mrb[122].mxu1  ;;  %v3094_v16 = vld [vmem:[#allocation2 + $0x404] ss:$8 sps:$4 sm:$0xff]   ;;  %v3097_v18 = vld [vmem:[#allocation2 + $0x414] ss:$8 sps:$4 sm:$0xff]  }
 0x4f0   :  { %v2808_v23 = vpop.f32.mrb[123].mxu1 }
 0x4f1   :  { %v1670_v26 = vadd.f32 %v2806_v20, %v3494_v39  ;;  %v2809_v34 = vadd.f32 %v2808_v23, %v2807_v21  ;;  %v3095_v20 = vld [vmem:[#allocation2 + $0x410] ss:$8 sps:$4 sm:$0xff]   ;;  %v3100_v21 = vld [vmem:[#allocation2 + $0x424] ss:$8 sps:$4 sm:$0xff]   ;;  %v3103_v23 = vld [vmem:[#allocation2 + $0x434] ss:$8 sps:$4 sm:$0xff]  }
 0x4f3   :  { %v1726_v36 = vmax.f32 %v1725_v15, %v1670_v26  ;;  %v1673_v14 = vadd.f32 %v2809_v34, %v3494_v39  ;;  %v3089_v15 = vld [vmem:[#allocation2 + $0x3f0] ss:$8 sps:$4 sm:$0xff]   ;;  %v3104_v26 = vld [vmem:[#allocation2 + $0x440] ss:$8 sps:$4 sm:$0xff]   ;;  %v3106_v34 = vld [vmem:[#allocation2 + $0x444] ss:$8 sps:$4 sm:$0xff]  }
 0x4f4   :  { %2402 = vmatprep.subr.bf16.mxu0 %v3106_v34 }
 0x4f5   :  { %v1727_v28 = vmax.f32 %v1726_v36, %v1673_v14  ;;  %v2810_v31 = vpop.f32.mrb[124].mxu1  ;;  %v3109_v36 = vld [vmem:[#allocation2 + $0x454] ss:$8 sps:$4 sm:$0xff]   ;;  %v3107_v14 = vld [vmem:[#allocation2 + $0x450] ss:$8 sps:$4 sm:$0xff]  }
 0x4f6   :  { %v2811_v35 = vpop.f32.mrb[125].mxu1 }
 0x4f7   :  { %v2812_v24 = vadd.f32 %v2811_v35, %v2810_v31  ;;  %v2813_v37 = vpop.f32.mrb[126].mxu1  ;;  %v3113_v31 = vld [vmem:[#allocation2 + $0x470] ss:$8 sps:$4 sm:$0xff]   ;;  %v3118_v35 = vld [vmem:[#allocation2 + $0x484] ss:$8 sps:$4 sm:$0xff]  }
 0x4f8   :  { %v2814_v40 = vpop.f32.mrb[127].mxu1 }
 0x4f9   :  { %v1678_v42 = vadd.f32 %v2812_v24, %v3494_v39  ;;  %v2815_v43 = vadd.f32 %v2814_v40, %v2813_v37  ;;  %v3116_v24 = vld [vmem:[#allocation2 + $0x480] ss:$8 sps:$4 sm:$0xff]   ;;  %v3121_v37 = vld [vmem:[#allocation2 + $0x494] ss:$8 sps:$4 sm:$0xff]   ;;  %v3124_v40 = vld [vmem:[#allocation2 + $0x4a4] ss:$8 sps:$4 sm:$0xff]  }
 0x4fb   :  { %v1728_v44 = vmax.f32 %v1727_v28, %v1678_v42  ;;  %v1681_v45 = vadd.f32 %v2815_v43, %v3494_v39  ;;  %v1754_v39 = vmul.f32 %v1722_v8, %v1722_v8  ;;  %v3080_v8 = vld [vmem:[#allocation2 + $0x3c0] ss:$8 sps:$4 sm:$0xff]   ;;  %v3115_v28 = vld [vmem:[#allocation2 + $0x474] ss:$8 sps:$4 sm:$0xff]   ;;  %v3125_v43 = vld [vmem:[#allocation2 + $0x4b0] ss:$8 sps:$4 sm:$0xff]  }
 0x4fc   :  { %v3127_v42 = vld [vmem:[#allocation2 + $0x4b4] ss:$8 sps:$4 sm:$0xff]  }
 0x4fd   :  { %v1729_v48 = vmax.f32 %v1728_v44, %v1681_v45  ;;  %v3130_v44 = vld [vmem:[#allocation2 + $0x4c4] ss:$8 sps:$4 sm:$0xff]   ;;  %v3128_v45 = vld [vmem:[#allocation2 + $0x4c0] ss:$8 sps:$4 sm:$0xff]  }
 0x4ff   :  { %v1730_v49 = vrot.slane %v1729_v48, 4 }
 0x501   :  { %v1731_v51 = vmax.f32 %v1729_v48, %v1730_v49  ;;  %v3136_v48 = vld [vmem:[#allocation2 + $0x4e4] ss:$8 sps:$4 sm:$0xff]   ;;  %v3134_v49 = vld [vmem:[#allocation2 + $0x4e0] ss:$8 sps:$4 sm:$0xff]  }
 0x503   :  { %v1732_v52 = vrot.slane %v1731_v51, 2 }
 0x505   :  { %v1733_v53 = vmax.f32 %v1731_v51, %v1732_v52  ;;  %v3137_v51 = vld [vmem:[#allocation2 + $0x4f0] ss:$8 sps:$4 sm:$0xff]   ;;  %v3142_v52 = vld [vmem:[#allocation2 + $0x504] ss:$8 sps:$4 sm:$0xff]  }
 0x507   :  { %v1734_v54 = vrot.slane %v1733_v53, 1 }
 0x509   :  { %v1735_v55 = vmax.f32 %v1733_v53, %v1734_v54  ;;  %v3140_v53 = vld [vmem:[#allocation2 + $0x500] ss:$8 sps:$4 sm:$0xff]   ;;  %v3145_v54 = vld [vmem:[#allocation2 + $0x514] ss:$8 sps:$4 sm:$0xff]  }
 0x50b   :  { %v1771_v57 = vmul.f32 %v1735_v55, %v3515_v19  ;;  %v1803_v58 = vpack.c.bf16 %v1735_v55, %v1735_v55  ;;  %v1755_v59 = vmul.f32 %v1735_v55, %v1735_v55  ;;  %v3074_v19 = vld [vmem:[#allocation2 + $0x3a0] ss:$8 sps:$4 sm:$0xff]   ;;  %v3143_v55 = vld [vmem:[#allocation2 + $0x510] ss:$8 sps:$4 sm:$0xff]  }
 0x50c   :  { %2165 = vmatpush1.bf16.msra.mxu1 %v3074_v19  ;;  %v3148_v19 = vld [vmem:[#allocation2 + $0x524] ss:$8 sps:$4 sm:$0xff]  }
 0x50d   :  { %v1774_v60 = vsel %vm1740_vm1, %v1771_v57, %v1770_v11  ;;  %v1818_v62 = vunpack.c.l.b16 %v1803_v58  ;;  %v1758_v63 = vsel %vm1740_vm1, %v1755_v59, %v1754_v39  ;;  %2166 = vmatprep.subr.bf16.mxu1 %v3079_v5  ;;  %v3088_v11 = vld [vmem:[#allocation2 + $0x3e4] ss:$8 sps:$4 sm:$0xff]   ;;  %v1808_v57 = vrot.slane %v2552_v56, %v3414_v30  ;;  %v3151_v5 = vld [vmem:[#allocation2 + $0x534] ss:$8 sps:$4 sm:$0xff]  }
 0x50e   :  { %v1776_v0 = vsel %vm1743_vm2, %v1774_v60, 0.0  ;;  %v1760_v1 = vsel %vm1743_vm2, %v1758_v63, 0.0  ;;  %v1812_v58 = vrot.slane %v2552_v56, %v3419_v32 }
 0x50f   :  { %1777 = vadd.xlane.f32.xlu1 %v1776_v0  ;;  %1761 = vadd.xlane.f32.xlu0 %v1760_v1  ;;  %v1819_v2 = vsel %vm1740_vm1, %v1818_v62, %v1817_v61 }
 0x510   :  { %v1820_v3 = vpack.c.b16 %v1819_v2, %v1819_v2  ;;  %2167 = vmatpush1.bf16.msra.mxu1 %v3077_v6  ;;  %v3149_v6 = vld [vmem:[#allocation2 + $0x530] ss:$8 sps:$4 sm:$0xff]  }
 0x511   :  { %2168 = vmatprep.subr.bf16.mxu1 %v3082_v7  ;;  %v2569_v7 = vld [vmem:[%s3561_s2 + $0x6] ss:$8 sm:$0x3] }
 0x512   :  { %1935 = vmatmul.mubr.bf16.vlgmr.msra.gmra.mrb[96].mxu0 %v1820_v3 }
 0x513   :  { %2403 = vmatpush1.bf16.msra.mxu0 %v3104_v26 }
 0x514   :  { %2169 = vmatpush1.bf16.msra.mxu1 %v3080_v8  ;;  %2404 = vmatprep.subr.bf16.mxu0 %v3109_v36  ;;  %v1985_v8 = vrot.slane %v2569_v7, %v3414_v30 }
 0x515   :  { %2170 = vmatprep.subr.bf16.mxu1 %v3085_v9  ;;  %v1989_v9 = vrot.slane %v2569_v7, %v3419_v32 }
 0x517   :  { %2405 = vmatpush1.bf16.msra.mxu0 %v3107_v14 }
 0x518   :  { %2171 = vmatpush1.bf16.msra.mxu1 %v3083_v10  ;;  %2406 = vmatprep.subr.bf16.mxu0 %v3112_v29 }
 0x519   :  { %2172 = vmatprep.subr.bf16.mxu1 %v3088_v11 }
 0x51b   :  { %2407 = vmatpush1.bf16.msra.mxu0 %v3110_v25 }
 0x51c   :  { %2173 = vmatpush1.bf16.msra.mxu1 %v3086_v12  ;;  %2408 = vmatprep.subr.bf16.mxu0 %v3115_v28 }
 0x51d   :  { %2174 = vmatprep.subr.bf16.mxu1 %v3091_v13 }
 0x51f   :  { %2409 = vmatpush1.bf16.msra.mxu0 %v3113_v31 }
 0x520   :  { %2175 = vmatpush1.bf16.msra.mxu1 %v3089_v15  ;;  %2410 = vmatprep.subr.bf16.mxu0 %v3118_v35 }
 0x521   :  { %2176 = vmatprep.subr.bf16.mxu1 %v3094_v16 }
 0x523   :  { %2411 = vmatpush1.bf16.msra.mxu0 %v3116_v24 }
 0x524   :  { %2177 = vmatpush1.bf16.msra.mxu1 %v3092_v17  ;;  %2412 = vmatprep.subr.bf16.mxu0 %v3121_v37 }
 0x525   :  { %2178 = vmatprep.subr.bf16.mxu1 %v3097_v18 }
 0x527   :  { %2413 = vmatpush1.bf16.msra.mxu0 %v3119_v38 }
 0x528   :  { %2179 = vmatpush1.bf16.msra.mxu1 %v3095_v20  ;;  %2414 = vmatprep.subr.bf16.mxu0 %v3124_v40  ;;  %v2444_v40 = vand.u32 127, %v1015_v27 }
 0x529   :  { %2180 = vmatprep.subr.bf16.mxu1 %v3100_v21 }
 0x52b   :  { %2415 = vmatpush1.bf16.msra.mxu0 %v3122_v41  ;;  %v2602_v41 = vld [vmem:[%s3561_s2 + $0x7] ss:$8 sm:$0x3] }
 0x52c   :  { %2181 = vmatpush1.bf16.msra.mxu1 %v3098_v22  ;;  %2416 = vmatprep.subr.bf16.mxu0 %v3127_v42  ;;  %v2445_v42 = vadd.s32 128, %v2444_v40 }
 0x52d   :  { %2182 = vmatprep.subr.bf16.mxu1 %v3103_v23 }
 0x52e   :  { %vm2447_vm7 = vcmp.eq.s32.totalorder %v2445_v42, 192 }
 0x52f   :  { %2417 = vmatpush1.bf16.msra.mxu0 %v3125_v43  ;;  %v2239_v43 = vrot.slane %v2602_v41, %v3419_v32 }
 0x530   :  { %2183 = vmatpush1.bf16.msra.mxu1 %v3101_v33  ;;  %2418 = vmatprep.subr.bf16.mxu0 %v3130_v44 }
 0x533   :  { %2419 = vmatpush1.bf16.msra.mxu0 %v3128_v45  ;;  %v2235_v45 = vrot.slane %v2602_v41, %v3414_v30 }
 0x534   :  { %2420 = vmatprep.subr.bf16.mxu0 %v3133_v46 }
 0x537   :  { %2421 = vmatpush1.bf16.msra.mxu0 %v3131_v47 }
 0x538   :  { %2422 = vmatprep.subr.bf16.mxu0 %v3136_v48 }
 0x53b   :  { %2423 = vmatpush1.bf16.msra.mxu0 %v3134_v49 }
 0x53c   :  { %2424 = vmatprep.subr.bf16.mxu0 %v3139_v50 }
 0x53f   :  { %2425 = vmatpush1.bf16.msra.mxu0 %v3137_v51 }
 0x540   :  { %2426 = vmatprep.subr.bf16.mxu0 %v3142_v52 }
 0x543   :  { %2427 = vmatpush1.bf16.msra.mxu0 %v3140_v53 }
 0x544   :  { %2428 = vmatprep.subr.bf16.mxu0 %v3145_v54 }
 0x547   :  { %2429 = vmatpush1.bf16.msra.mxu0 %v3143_v55 }
 0x548   :  { %2430 = vmatprep.subr.bf16.mxu0 %v3148_v19 }
 0x54b   :  { %2431 = vmatpush1.bf16.msra.mxu0 %v3146_v4 }
 0x54c   :  { %2432 = vmatprep.subr.bf16.mxu0 %v3151_v5 }
 0x54f   :  { %2433 = vmatpush1.bf16.msra.mxu0 %v3149_v6 }
 0x55c   :  { %v1746_v22 = vpop.xlane.xlu0 %1745 }
 0x55d   :  { %vm1749_vm4 = vcmp.eq.f32.partialorder %v1746_v22, inf  ;;  %v1752_v28 = vand.u32 2147483648, %v1746_v22  ;;  %vm1751_vm6 = vcmp.eq.f32.partialorder %v1746_v22, 0.0 }
 0x59c   :  { %v1762_v23 = vpop.xlane.xlu0 %1761  ;;  %v1778_v47 = vpop.xlane.xlu1 %1777 }
 0x59d   :  { %3152 = vrsqrt.f32 %v1762_v23  ;;  %vm1765_vm3 = vcmp.eq.f32.partialorder %v1762_v23, inf  ;;  %v1768_v29 = vand.u32 2147483648, %v1762_v23  ;;  %vm1767_vm5 = vcmp.eq.f32.partialorder %v1762_v23, 0.0 }
 0x59e   :  { %3154 = vrsqrt.f32 %v1746_v22 }
 0x5a7   :  { %v3153_v33 = vpop.eup %3152 }
 0x5a8   :  { %v3155_v26 = vpop.eup %3154  ;;  %v1764_v34 = vmul.f32 %v3153_v33, %v1762_v23 }
 0x5a9   :  { %v1748_v36 = vmul.f32 %v3155_v26, %v1746_v22 }
 0x5aa   :  { %v1766_v14 = vsel %vm1765_vm3, %v1762_v23, %v1764_v34 }
 0x5ab   :  { %v1750_v25 = vsel %vm1749_vm4, %v1746_v22, %v1748_v36  ;;  %v1769_v31 = vsel %vm1767_vm5, %v1768_v29, %v1766_v14 }
 0x5ac   :  { %v1753_v35 = vsel %vm1751_vm6, %v1752_v28, %v1750_v25  ;;  %v1780_v24 = vmax.f32 %v1769_v31, 1e-08 }
 0x5ad   :  { %v1779_v37 = vmax.f32 %v1753_v35, 1e-08 }
 0x5af   :  { %v1781_v38 = vmul.f32 %v1780_v24, %v1779_v37 }
 0x5b1   :  { %3156 = vrcp.f32 %v1781_v38 }
 0x5bb   :  { %v3157_v44 = vpop.eup %3156 }
 0x5bc   :  { %v1783_v49 = vmul.f32 %v3157_v44, %v1778_v47 }
 0x5e5   :  { %v1936_v39 = vpop.f32.mrb[96].mxu0 }
 0x5e6   :  { %v1937_v59 = vadd.f32 %v1936_v39, %v1808_v57  ;;  %v1938_v60 = vpop.f32.mrb[97].mxu0 }
 0x5e7   :  { %v1939_v61 = vadd.f32 %v1938_v60, %v1812_v58  ;;  %v1940_v62 = vpop.f32.mrb[98].mxu0 }
 0x5e8   :  { %v1943_v63 = vmax.f32 %v1937_v59, 0.0  ;;  %v1941_v0 = vpop.f32.mrb[99].mxu0 }
 0x5e9   :  { %v1944_v1 = vmax.f32 %v1939_v61, 0.0 }
 0x5ea   :  { %v1979_v3 = vpack.c.bf16 %v1943_v63, %v1943_v63 }
 0x5eb   :  { %v1980_v2 = vpack.c.bf16 %v1944_v1, %v1944_v1 }
 0x5ed   :  { %2184 = vmatprep.mubr.bf16.mxu1 %v1980_v2 }
 0x5ee   :  { %2185 = vmatmul.mubr.bf16.vlgmr.msra.gmra.mrb[128].mxu1 %v1979_v3 }
 0x6c1   :  { %v2186_v10 = vpop.f32.mrb[128].mxu1 }
 0x6c2   :  { %v2187_v11 = vadd.f32 %v2186_v10, %v1985_v8  ;;  %v2188_v12 = vpop.f32.mrb[129].mxu1 }
 0x6c3   :  { %v2189_v13 = vadd.f32 %v2188_v12, %v1989_v9  ;;  %v2190_v15 = vpop.f32.mrb[130].mxu1 }
 0x6c4   :  { %v2193_v16 = vmax.f32 %v2187_v11, 0.0  ;;  %v2191_v17 = vpop.f32.mrb[131].mxu1 }
 0x6c5   :  { %v2194_v18 = vmax.f32 %v2189_v13, 0.0 }
 0x6c6   :  { %v2229_v21 = vpack.c.bf16 %v2193_v16, %v2193_v16 }
 0x6c7   :  { %v2230_v20 = vpack.c.bf16 %v2194_v18, %v2194_v18 }
 0x6c9   :  { %2434 = vmatprep.mubr.bf16.mxu0 %v2230_v20 }
 0x6ca   :  { %2435 = vmatmul.mubr.bf16.vlgmr.msra.gmra.mrb[100].mxu0 %v2229_v21 }
 0x79d   :  { %v2436_v46 = vpop.f32.mrb[100].mxu0 }
 0x79e   :  { %v2438_v48 = vpop.f32.mrb[101].mxu0  ;;  %v2437_v52 = vadd.f32 %v2436_v46, %v2235_v45 }
 0x79f   :  { %v2439_v50 = vadd.f32 %v2438_v48, %v2239_v43  ;;  %v2440_v51 = vpop.f32.mrb[102].mxu0 }
 0x7a0   :  { %v2441_v53 = vpop.f32.mrb[103].mxu0 }
 0x7a1   :  { %v2449_v27 = vsel %vm2447_vm7, %v1783_v49, %v2439_v50 }
 0x7a2   :  { %v2452_v54 = vcombine.low %v2437_v52, %v2449_v27 }
 0x7a4   :  { %2635 = vst.sshfl [vmem:[%s3562_s3] sm:$0x33 pattern:$0x76325410] %v2452_v54 }
 0x7a5   :  { %2466 = vsyncpa [#allocation3], 1 }

</bundles_post_ra>
